<compile_context>
chip_gen: v5e
topology: v5e:2x2
jax: 0.10.0
libtpu: 0.0.40
codegen_flags: <defaults>
</compile_context>

<pallas_src>
import jax
import jax.numpy as jnp
from jax.experimental import pallas as pl
from jax.experimental.pallas import tpu as pltpu


def _round_up(x, m):
    return (x + m - 1) // m * m


def _vmem_limit_bytes():
    # Per-chip scoped-VMEM budget: ~75% of physical VMEM (v5e/v6e: 128 MiB -> 96 MiB,
    # v7x: 64 MiB/TC -> 48 MiB).  With the per-sample tile this is far more than needed,
    # but it leaves the auto-pipeline free to buffer deeply on the bigger chips.
    try:
        cap = int(pltpu.get_tpu_info().vmem_capacity_bytes)
    except Exception:
        cap = 64 * 1024 * 1024
    return min(cap * 3 // 4, 112 * 1024 * 1024)


def _conv_stats_kernel(xe_ref, xo_ref, w_ref, ze_ref, zo_ref, mean_ref, m2_ref):
    """Pass 1: 3x3 conv (stride 1, pad 1) + per-tile centered BN partial statistics.

    xe_ref/xo_ref : (1, H+2, W/2, 3*Cin) bf16  dx-fused, W-parity-split padded input (1 sample)
    w_ref         : (3, 3*Cin, Coutp)    bf16  weights, dx fused into K per dy tap, Cout padded
    ze_ref/zo_ref : (H*W/2, Coutp)       bf16  conv output per parity (bias elided: exactly
                                               cancelled by train-mode BatchNorm)
    mean_ref      : (1, 1, Coutp)        f32   per-tile mean of z
    m2_ref        : (1, 1, Coutp)        f32   per-tile centered sum of squares of z
    """
    _, hp, w2, k3 = xe_ref.shape
    h = hp - 2
    coutp = w_ref.shape[-1]
    m = h * w2                     # rows per parity (batch tile pinned to 1)
    inv_m = 1.0 / m

    def conv_one_parity(x_ref):
        # One big (M, K) x (K, Coutp) MXU matmul per dy tap, f32 accumulate.
        # The slice is on a leading dim and the (h, w2) merge is sublane-aligned
        # (bt == 1, w2 % 8 == 0) -> free view, no VMEM relayout copy.
        acc = jnp.zeros((m, coutp), jnp.float32)
        for dy in range(3):
            patch = x_ref[:, dy:dy + h, :, :].reshape(m, k3)
            acc = acc + jnp.dot(patch, w_ref[dy],
                                preferred_element_type=jnp.float32)
        return acc

    # Even parity: conv -> centered stats (f32) -> bf16 store; the f32 block is then dead
    # before the odd parity is computed (keeps peak live VMEM to ~one f32 (m, Coutp) block).
    ze = conv_one_parity(xe_ref)
    mu_e = jnp.sum(ze, axis=0, keepdims=True) * inv_m          # (1, Coutp)
    m2_e = jnp.sum((ze - mu_e) ** 2, axis=0, keepdims=True)    # centered sum of squares
    ze_ref[...] = ze.astype(ze_ref.dtype)

    zo = conv_one_parity(xo_ref)
    mu_o = jnp.sum(zo, axis=0, keepdims=True) * inv_m
    m2_o = jnp.sum((zo - mu_o) ** 2, axis=0, keepdims=True)
    zo_ref[...] = zo.astype(zo_ref.dtype)

    # Chan parallel-variance combine of the two equal-count parities.
    mu_t = 0.5 * (mu_e + mu_o)
    d = mu_e - mu_o
    m2_t = m2_e + m2_o + (0.5 * m) * d * d

    mean_ref[...] = mu_t.reshape(1, 1, coutp)
    m2_ref[...] = m2_t.reshape(1, 1, coutp)


def _bn_relu_pool_kernel(ze_ref, zo_ref, scale_ref, shift_ref, o_ref):
    """Pass 2: folded BN affine (z*scale + shift) + ReLU + 2x2 max-pool (stride 2).

    z arrives in bf16 (HBM traffic) and is upcast to f32 for the epilogue math
    (v5e has no bf16 VPU/EUP; f32 epilogue is also the accurate choice everywhere).
    """
    bt, h, w2, coutp = ze_ref.shape
    scale = scale_ref[...]                               # (1, Coutp), broadcasts over lanes
    shift = shift_ref[...]
    ye = jnp.maximum(ze_ref[...].astype(jnp.float32) * scale + shift, 0.0)
    yo = jnp.maximum(zo_ref[...].astype(jnp.float32) * scale + shift, 0.0)
    y = jnp.maximum(ye, yo)                              # pool along W (= max over column parities)
    y = y.reshape(bt, h // 2, 2, w2, coutp)              # group adjacent rows (leading-dim split)
    o_ref[...] = jnp.max(y, axis=2)                      # pool along H


def conv_block_forward(x_nchw, w_hwio, bias, gamma, beta, eps=1e-5):
    """ConvBlock.forward (train-mode BatchNorm).  `bias` is accepted for interface fidelity but
    unused: a conv bias followed by train-mode BatchNorm is mathematically a no-op on the output
    (the batch mean cancels it)."""
    del bias
    n, cin, h, wd = x_nchw.shape
    cout = w_hwio.shape[-1]
    assert h % 2 == 0, "H must be even for MaxPool2d(2)"
    assert wd % 16 == 0, "W must be a multiple of 16 (pool needs W even; W/2 sublane-aligned)"
    h2, w2 = h // 2, wd // 2
    k3 = 3 * cin
    m = h * w2                      # matmul rows per parity per sample
    nt = n                          # batch tile pinned to 1  -> grid = N (>= 2 for megacore)
    coutp = _round_up(cout, 128)    # lane-dense matmul N-dim, z stores and pooled stores

    # ---- input prep (plain-JAX glue): NCHW -> NHWC, pad, bf16, dx-fuse + W-parity split ----
    # xs[j][n, r, wo, c] = x_pad[n, r, j + 2*wo, c].  Even output columns read dx taps xs[0..2],
    # odd columns xs[1..3]; concatenating the taps along channels gives K = 3*Cin for the MXU
    # and keeps every in-kernel slice on a leading dim.
    x = jnp.transpose(x_nchw, (0, 2, 3, 1)).astype(jnp.bfloat16)      # NHWC
    x_pad = jnp.pad(x, ((0, 0), (1, 1), (1, 1), (0, 0)))              # (N, H+2, W+2, Cin)
    xs = [x_pad[:, :, j:j + wd:2, :] for j in range(4)]               # each (N, H+2, W/2, Cin)
    x_even = jnp.concatenate(xs[0:3], axis=-1)                        # (N, H+2, W/2, 3*Cin)
    x_odd = jnp.concatenate(xs[1:4], axis=-1)

    # Weights: HWIO (3, 3, Cin, Cout) -> pad Cout to Coutp -> (dy, dx*Cin + ci, Coutp), bf16.
    w_pad = jnp.pad(w_hwio, ((0, 0), (0, 0), (0, 0), (0, coutp - cout)))
    w3 = w_pad.reshape(3, k3, coutp).astype(jnp.bfloat16)
    gamma_p = jnp.pad(gamma.astype(jnp.float32), (0, coutp - cout), constant_values=1.0)
    beta_p = jnp.pad(beta.astype(jnp.float32), (0, coutp - cout))

    cparams = pltpu.CompilerParams(
        # Per-sample grid axis is fully independent -> "parallel" (megacore sharding on v7x).
        dimension_semantics=("parallel",),
        vmem_limit_bytes=_vmem_limit_bytes(),
    )

    # ---- cost estimates (lets XLA overlap the surrounding glue ops with the kernels) ----
    flops_conv = 2 * 9 * cin * coutp * n * h * wd                     # 2*M*K*N over taps/parities
    bytes_p1 = (2 * n * (h + 2) * w2 * k3 * 2      # x_even + x_odd (bf16)
                + 3 * k3 * coutp * 2               # weights (bf16)
                + 2 * n * m * coutp * 2            # ze + zo writeback (bf16)
                + 2 * n * coutp * 4)               # per-tile mean / M2 (f32)
    ce1 = pl.CostEstimate(flops=int(flops_conv), transcendentals=0,
                          bytes_accessed=int(bytes_p1))
    bytes_p2 = (2 * n * m * coutp * 2              # ze + zo reads (bf16)
                + n * h2 * w2 * coutp * 4          # pooled output (f32)
                + 2 * coutp * 4)                   # scale / shift
    ce2 = pl.CostEstimate(flops=int(8 * n * h * w2 * coutp), transcendentals=0,
                          bytes_accessed=int(bytes_p2))

    # ---- pass 1: conv + per-tile centered BN statistics, one sample per grid step ----
    ze2, zo2, pmean, pm2 = pl.pallas_call(
        _conv_stats_kernel,
        out_shape=(
            jax.ShapeDtypeStruct((n * m, coutp), jnp.bfloat16),       # z, even output columns
            jax.ShapeDtypeStruct((n * m, coutp), jnp.bfloat16),       # z, odd output columns
            jax.ShapeDtypeStruct((nt, 1, coutp), jnp.float32),        # per-tile mean
            jax.ShapeDtypeStruct((nt, 1, coutp), jnp.float32),        # per-tile centered sumsq
        ),
        grid=(nt,),
        in_specs=[
            pl.BlockSpec((1, h + 2, w2, k3), lambda i: (i, 0, 0, 0)),
            pl.BlockSpec((1, h + 2, w2, k3), lambda i: (i, 0, 0, 0)),
            pl.BlockSpec((3, k3, coutp), lambda i: (0, 0, 0)),
        ],
        out_specs=(
            pl.BlockSpec((m, coutp), lambda i: (i, 0)),
            pl.BlockSpec((m, coutp), lambda i: (i, 0)),
            pl.BlockSpec((1, 1, coutp), lambda i: (i, 0, 0)),
            pl.BlockSpec((1, 1, coutp), lambda i: (i, 0, 0)),
        ),
        compiler_params=cparams,
        cost_estimate=ce1,
    )(x_even, x_odd, w3)

    # ---- per-channel BN scale/shift (tiny O(Cout) math, plain JAX) ----
    # Chan combine of the equal-count per-tile partials: mean = avg of tile means,
    # M2 = sum(M2_i) + c_tile * sum((mu_i - mean)^2); biased variance = M2 / (N*H*W).
    cnt = jnp.float32(n * h * wd)
    c_tile = jnp.float32(h * wd)
    mean = jnp.sum(pmean, axis=(0, 1)) / jnp.float32(nt)              # (Coutp,)
    m2 = jnp.sum(pm2, axis=(0, 1)) + c_tile * jnp.sum((pmean - mean) ** 2, axis=(0, 1))
    var = m2 / cnt
    inv_std = jax.lax.rsqrt(var + jnp.float32(eps))
    scale = (gamma_p * inv_std).reshape(1, coutp).astype(jnp.float32)
    shift = (beta_p - mean * gamma_p * inv_std).reshape(1, coutp).astype(jnp.float32)

    # Free (contiguous) reshapes to the 4-D view pass 2 consumes.
    ze4 = ze2.reshape(n, h, w2, coutp)
    zo4 = zo2.reshape(n, h, w2, coutp)

    # ---- pass 2: folded affine + ReLU + 2x2 max-pool, one sample per grid step ----
    out = pl.pallas_call(
        _bn_relu_pool_kernel,
        out_shape=jax.ShapeDtypeStruct((n, h2, w2, coutp), jnp.float32),
        grid=(nt,),
        in_specs=[
            pl.BlockSpec((1, h, w2, coutp), lambda i: (i, 0, 0, 0)),
            pl.BlockSpec((1, h, w2, coutp), lambda i: (i, 0, 0, 0)),
            pl.BlockSpec((1, coutp), lambda i: (0, 0)),
            pl.BlockSpec((1, coutp), lambda i: (0, 0)),
        ],
        out_specs=pl.BlockSpec((1, h2, w2, coutp), lambda i: (i, 0, 0, 0)),
        compiler_params=cparams,
        cost_estimate=ce2,
    )(ze4, zo4, scale, shift)

    # Drop the channel padding, then pooled NHWC -> NCHW.
    return jnp.transpose(out[..., :cout], (0, 3, 1, 2))


def reference_forward(x_nchw, w_hwio, bias, gamma, beta, eps=1e-5):
    # Pure-JAX reference of ConvBlock.forward (train-mode BN), for validation.
    x = jnp.transpose(x_nchw, (0, 2, 3, 1))
    z = jax.lax.conv_general_dilated(
        x, w_hwio, window_strides=(1, 1), padding='SAME',
        dimension_numbers=('NHWC', 'HWIO', 'NHWC')) + bias
    mean = jnp.mean(z, axis=(0, 1, 2))
    var = jnp.mean((z - mean) ** 2, axis=(0, 1, 2))
    y = (z - mean) * jax.lax.rsqrt(var + eps) * gamma + beta
    y = jnp.maximum(y, 0.0)
    nn, hh, ww, cc = y.shape
    y = y.reshape(nn, hh // 2, 2, ww // 2, 2, cc).max(axis=(2, 4))
    return jnp.transpose(y, (0, 3, 1, 2))


if __name__ == "__main__":
    key = jax.random.PRNGKey(0)
    k1, k2, k3, k4, k5 = jax.random.split(key, 5)
    N, Cin, H, W, Cout = 2, 4, 16, 16, 8

    x = jax.random.normal(k1, (N, Cin, H, W), jnp.float32)
    # Conv2d(Cin, Cout, 3) weight, generated directly in HWIO layout
    # (equivalent to PyTorch OIHW weight transposed by (2, 3, 1, 0)).
    w = 0.1 * jax.random.normal(k2, (3, 3, Cin, Cout), jnp.float32)
    bias = 0.1 * jax.random.normal(k3, (Cout,), jnp.float32)
    gamma = 1.0 + 0.1 * jax.random.normal(k4, (Cout,), jnp.float32)
    beta = 0.1 * jax.random.normal(k5, (Cout,), jnp.float32)

    fwd = jax.jit(conv_block_forward)
    out = fwd(x, w, bias, gamma, beta)
    out = jax.block_until_ready(out)

    ref = reference_forward(x, w, bias, gamma, beta)
    assert out.shape == (N, Cout, H // 2, W // 2), out.shape
    max_err = float(jnp.max(jnp.abs(out - ref)))
    # bf16 matmul inputs + bf16 z storage (f32 accumulation, f32 stats & epilogue): expected
    # error after BN normalization is O(1e-2); 5e-2 gives a comfortable margin.
    assert max_err < 5e-2, f"max abs error too large: {max_err}"
    print("KERNEL_OK")
</pallas_src>

<mosaic_0001>
module attributes {stable_mosaic.version = 11 : i64} {
  func.func @_conv_stats_kernel(%arg0: i32, %arg1: memref<1x18x8x12xbf16, #tpu.memory_space<vmem>>, %arg2: memref<1x18x8x12xbf16, #tpu.memory_space<vmem>>, %arg3: memref<3x12x128xbf16, #tpu.memory_space<vmem>>, %arg4: memref<128x128xbf16, #tpu.memory_space<vmem>>, %arg5: memref<128x128xbf16, #tpu.memory_space<vmem>>, %arg6: memref<1x1x128xf32, #tpu.memory_space<vmem>>, %arg7: memref<1x1x128xf32, #tpu.memory_space<vmem>>) attributes {dimension_semantics = [#tpu.dimension_semantics<parallel>], iteration_bounds = array<i64: 2>, scalar_prefetch = 0 : i64, scratch_operands = 0 : i64, tpu.core_type = #tpu.core_type<tc>, window_params = [{transform_indices = @transform_0, window_bounds = array<i64: 1, 18, 8, 12>}, {transform_indices = @transform_1, window_bounds = array<i64: 1, 18, 8, 12>}, {pipeline_mode = #tpu.pipeline_mode<synchronous>, transform_indices = @transform_2, window_bounds = array<i64: 3, 12, 128>}, {transform_indices = @transform_3, window_bounds = array<i64: 128, 128>}, {transform_indices = @transform_4, window_bounds = array<i64: 128, 128>}, {transform_indices = @transform_5, window_bounds = array<i64: 1, 1, 128>}, {transform_indices = @transform_6, window_bounds = array<i64: 1, 1, 128>}]} {
    %cst = arith.constant 0.000000e+00 : f32
    %0 = vector.broadcast %cst : f32 to vector<128x128xf32>
    %c0 = arith.constant 0 : index
    %c0_0 = arith.constant 0 : index
    %c0_1 = arith.constant 0 : index
    %c0_2 = arith.constant 0 : index
    %1 = vector.load %arg1[%c0, %c0_0, %c0_1, %c0_2] : memref<1x18x8x12xbf16, #tpu.memory_space<vmem>>, vector<1x16x8x12xbf16>
    %2 = vector.shape_cast %1 : vector<1x16x8x12xbf16> to vector<128x12xbf16>
    %c0_3 = arith.constant 0 : index
    %c0_4 = arith.constant 0 : index
    %c0_5 = arith.constant 0 : index
    %3 = vector.load %arg3[%c0_3, %c0_4, %c0_5] : memref<3x12x128xbf16, #tpu.memory_space<vmem>>, vector<1x12x128xbf16>
    %4 = vector.shape_cast %3 : vector<1x12x128xbf16> to vector<12x128xbf16>
    %cst_6 = arith.constant dense<0.000000e+00> : vector<128x128xf32>
    %5 = tpu.matmul %2, %4, %cst_6 {dimension_numbers = #tpu.dot_dimension_numbers<[1], [0], [0], [1], [0, 0, 1, 1], [], []>} : vector<128x12xbf16>, vector<12x128xbf16>, vector<128x128xf32> -> vector<128x128xf32>
    %6 = arith.addf %0, %5 : vector<128x128xf32>
    %c0_7 = arith.constant 0 : index
    %c1 = arith.constant 1 : index
    %c0_8 = arith.constant 0 : index
    %c0_9 = arith.constant 0 : index
    %7 = vector.load %arg1[%c0_7, %c1, %c0_8, %c0_9] : memref<1x18x8x12xbf16, #tpu.memory_space<vmem>>, vector<1x16x8x12xbf16>
    %8 = vector.shape_cast %7 : vector<1x16x8x12xbf16> to vector<128x12xbf16>
    %c1_10 = arith.constant 1 : index
    %c0_11 = arith.constant 0 : index
    %c0_12 = arith.constant 0 : index
    %9 = vector.load %arg3[%c1_10, %c0_11, %c0_12] : memref<3x12x128xbf16, #tpu.memory_space<vmem>>, vector<1x12x128xbf16>
    %10 = vector.shape_cast %9 : vector<1x12x128xbf16> to vector<12x128xbf16>
    %cst_13 = arith.constant dense<0.000000e+00> : vector<128x128xf32>
    %11 = tpu.matmul %8, %10, %cst_13 {dimension_numbers = #tpu.dot_dimension_numbers<[1], [0], [0], [1], [0, 0, 1, 1], [], []>} : vector<128x12xbf16>, vector<12x128xbf16>, vector<128x128xf32> -> vector<128x128xf32>
    %12 = arith.addf %6, %11 : vector<128x128xf32>
    %c0_14 = arith.constant 0 : index
    %c2 = arith.constant 2 : index
    %c0_15 = arith.constant 0 : index
    %c0_16 = arith.constant 0 : index
    %13 = vector.load %arg1[%c0_14, %c2, %c0_15, %c0_16] : memref<1x18x8x12xbf16, #tpu.memory_space<vmem>>, vector<1x16x8x12xbf16>
    %14 = vector.shape_cast %13 : vector<1x16x8x12xbf16> to vector<128x12xbf16>
    %c2_17 = arith.constant 2 : index
    %c0_18 = arith.constant 0 : index
    %c0_19 = arith.constant 0 : index
    %15 = vector.load %arg3[%c2_17, %c0_18, %c0_19] : memref<3x12x128xbf16, #tpu.memory_space<vmem>>, vector<1x12x128xbf16>
    %16 = vector.shape_cast %15 : vector<1x12x128xbf16> to vector<12x128xbf16>
    %cst_20 = arith.constant dense<0.000000e+00> : vector<128x128xf32>
    %17 = tpu.matmul %14, %16, %cst_20 {dimension_numbers = #tpu.dot_dimension_numbers<[1], [0], [0], [1], [0, 0, 1, 1], [], []>} : vector<128x12xbf16>, vector<12x128xbf16>, vector<128x128xf32> -> vector<128x128xf32>
    %18 = arith.addf %12, %17 : vector<128x128xf32>
    %cst_21 = arith.constant dense<0.000000e+00> : vector<128xf32>
    %19 = vector.multi_reduction <add>, %18, %cst_21 [0] : vector<128x128xf32> to vector<128xf32>
    %20 = vector.shape_cast %19 : vector<128xf32> to vector<1x128xf32>
    %cst_22 = arith.constant 7.812500e-03 : f32
    %21 = vector.broadcast %cst_22 : f32 to vector<1x128xf32>
    %22 = arith.mulf %20, %21 : vector<1x128xf32>
    %23 = vector.broadcast %22 : vector<1x128xf32> to vector<128x128xf32>
    %24 = arith.subf %18, %23 : vector<128x128xf32>
    %25 = arith.mulf %24, %24 : vector<128x128xf32>
    %cst_23 = arith.constant dense<0.000000e+00> : vector<128xf32>
    %26 = vector.multi_reduction <add>, %25, %cst_23 [0] : vector<128x128xf32> to vector<128xf32>
    %27 = vector.shape_cast %26 : vector<128xf32> to vector<1x128xf32>
    %28 = arith.truncf %18 : vector<128x128xf32> to vector<128x128xbf16>
    %c0_24 = arith.constant 0 : index
    %c0_25 = arith.constant 0 : index
    %29 = vector.load %arg4[%c0_24, %c0_25] : memref<128x128xbf16, #tpu.memory_space<vmem>>, vector<128x128xbf16>
    tpu.vector_store %arg4[%c0_24, %c0_25], %28 {strides = array<i32>} : memref<128x128xbf16, #tpu.memory_space<vmem>>, vector<128x128xbf16>,
    %cst_26 = arith.constant 0.000000e+00 : f32
    %30 = vector.broadcast %cst_26 : f32 to vector<128x128xf32>
    %c0_27 = arith.constant 0 : index
    %c0_28 = arith.constant 0 : index
    %c0_29 = arith.constant 0 : index
    %c0_30 = arith.constant 0 : index
    %31 = vector.load %arg2[%c0_27, %c0_28, %c0_29, %c0_30] : memref<1x18x8x12xbf16, #tpu.memory_space<vmem>>, vector<1x16x8x12xbf16>
    %32 = vector.shape_cast %31 : vector<1x16x8x12xbf16> to vector<128x12xbf16>
    %c0_31 = arith.constant 0 : index
    %c0_32 = arith.constant 0 : index
    %c0_33 = arith.constant 0 : index
    %33 = vector.load %arg3[%c0_31, %c0_32, %c0_33] : memref<3x12x128xbf16, #tpu.memory_space<vmem>>, vector<1x12x128xbf16>
    %34 = vector.shape_cast %33 : vector<1x12x128xbf16> to vector<12x128xbf16>
    %cst_34 = arith.constant dense<0.000000e+00> : vector<128x128xf32>
    %35 = tpu.matmul %32, %34, %cst_34 {dimension_numbers = #tpu.dot_dimension_numbers<[1], [0], [0], [1], [0, 0, 1, 1], [], []>} : vector<128x12xbf16>, vector<12x128xbf16>, vector<128x128xf32> -> vector<128x128xf32>
    %36 = arith.addf %30, %35 : vector<128x128xf32>
    %c0_35 = arith.constant 0 : index
    %c1_36 = arith.constant 1 : index
    %c0_37 = arith.constant 0 : index
    %c0_38 = arith.constant 0 : index
    %37 = vector.load %arg2[%c0_35, %c1_36, %c0_37, %c0_38] : memref<1x18x8x12xbf16, #tpu.memory_space<vmem>>, vector<1x16x8x12xbf16>
    %38 = vector.shape_cast %37 : vector<1x16x8x12xbf16> to vector<128x12xbf16>
    %c1_39 = arith.constant 1 : index
    %c0_40 = arith.constant 0 : index
    %c0_41 = arith.constant 0 : index
    %39 = vector.load %arg3[%c1_39, %c0_40, %c0_41] : memref<3x12x128xbf16, #tpu.memory_space<vmem>>, vector<1x12x128xbf16>
    %40 = vector.shape_cast %39 : vector<1x12x128xbf16> to vector<12x128xbf16>
    %cst_42 = arith.constant dense<0.000000e+00> : vector<128x128xf32>
    %41 = tpu.matmul %38, %40, %cst_42 {dimension_numbers = #tpu.dot_dimension_numbers<[1], [0], [0], [1], [0, 0, 1, 1], [], []>} : vector<128x12xbf16>, vector<12x128xbf16>, vector<128x128xf32> -> vector<128x128xf32>
    %42 = arith.addf %36, %41 : vector<128x128xf32>
    %c0_43 = arith.constant 0 : index
    %c2_44 = arith.constant 2 : index
    %c0_45 = arith.constant 0 : index
    %c0_46 = arith.constant 0 : index
    %43 = vector.load %arg2[%c0_43, %c2_44, %c0_45, %c0_46] : memref<1x18x8x12xbf16, #tpu.memory_space<vmem>>, vector<1x16x8x12xbf16>
    %44 = vector.shape_cast %43 : vector<1x16x8x12xbf16> to vector<128x12xbf16>
    %c2_47 = arith.constant 2 : index
    %c0_48 = arith.constant 0 : index
    %c0_49 = arith.constant 0 : index
    %45 = vector.load %arg3[%c2_47, %c0_48, %c0_49] : memref<3x12x128xbf16, #tpu.memory_space<vmem>>, vector<1x12x128xbf16>
    %46 = vector.shape_cast %45 : vector<1x12x128xbf16> to vector<12x128xbf16>
    %cst_50 = arith.constant dense<0.000000e+00> : vector<128x128xf32>
    %47 = tpu.matmul %44, %46, %cst_50 {dimension_numbers = #tpu.dot_dimension_numbers<[1], [0], [0], [1], [0, 0, 1, 1], [], []>} : vector<128x12xbf16>, vector<12x128xbf16>, vector<128x128xf32> -> vector<128x128xf32>
    %48 = arith.addf %42, %47 : vector<128x128xf32>
    %cst_51 = arith.constant dense<0.000000e+00> : vector<128xf32>
    %49 = vector.multi_reduction <add>, %48, %cst_51 [0] : vector<128x128xf32> to vector<128xf32>
    %50 = vector.shape_cast %49 : vector<128xf32> to vector<1x128xf32>
    %cst_52 = arith.constant 7.812500e-03 : f32
    %51 = vector.broadcast %cst_52 : f32 to vector<1x128xf32>
    %52 = arith.mulf %50, %51 : vector<1x128xf32>
    %53 = vector.broadcast %52 : vector<1x128xf32> to vector<128x128xf32>
    %54 = arith.subf %48, %53 : vector<128x128xf32>
    %55 = arith.mulf %54, %54 : vector<128x128xf32>
    %cst_53 = arith.constant dense<0.000000e+00> : vector<128xf32>
    %56 = vector.multi_reduction <add>, %55, %cst_53 [0] : vector<128x128xf32> to vector<128xf32>
    %57 = vector.shape_cast %56 : vector<128xf32> to vector<1x128xf32>
    %58 = arith.truncf %48 : vector<128x128xf32> to vector<128x128xbf16>
    %c0_54 = arith.constant 0 : index
    %c0_55 = arith.constant 0 : index
    %59 = vector.load %arg5[%c0_54, %c0_55] : memref<128x128xbf16, #tpu.memory_space<vmem>>, vector<128x128xbf16>
    tpu.vector_store %arg5[%c0_54, %c0_55], %58 {strides = array<i32>} : memref<128x128xbf16, #tpu.memory_space<vmem>>, vector<128x128xbf16>,
    %60 = arith.addf %22, %52 : vector<1x128xf32>
    %cst_56 = arith.constant 5.000000e-01 : f32
    %61 = vector.broadcast %cst_56 : f32 to vector<1x128xf32>
    %62 = arith.mulf %61, %60 : vector<1x128xf32>
    %63 = arith.subf %22, %52 : vector<1x128xf32>
    %64 = arith.addf %27, %57 : vector<1x128xf32>
    %cst_57 = arith.constant 6.400000e+01 : f32
    %65 = vector.broadcast %cst_57 : f32 to vector<1x128xf32>
    %66 = arith.mulf %65, %63 : vector<1x128xf32>
    %67 = arith.mulf %66, %63 : vector<1x128xf32>
    %68 = arith.addf %64, %67 : vector<1x128xf32>
    %69 = vector.shape_cast %62 : vector<1x128xf32> to vector<1x1x128xf32>
    %c0_58 = arith.constant 0 : index
    %c0_59 = arith.constant 0 : index
    %c0_60 = arith.constant 0 : index
    %70 = vector.load %arg6[%c0_58, %c0_59, %c0_60] : memref<1x1x128xf32, #tpu.memory_space<vmem>>, vector<1x1x128xf32>
    tpu.vector_store %arg6[%c0_58, %c0_59, %c0_60], %69 {strides = array<i32>} : memref<1x1x128xf32, #tpu.memory_space<vmem>>, vector<1x1x128xf32>,
    %71 = vector.shape_cast %68 : vector<1x128xf32> to vector<1x1x128xf32>
    %c0_61 = arith.constant 0 : index
    %c0_62 = arith.constant 0 : index
    %c0_63 = arith.constant 0 : index
    %72 = vector.load %arg7[%c0_61, %c0_62, %c0_63] : memref<1x1x128xf32, #tpu.memory_space<vmem>>, vector<1x1x128xf32>
    tpu.vector_store %arg7[%c0_61, %c0_62, %c0_63], %71 {strides = array<i32>} : memref<1x1x128xf32, #tpu.memory_space<vmem>>, vector<1x1x128xf32>,
    return
  }
  func.func @transform_0(%arg0: i32) -> (i32, i32, i32, i32) {
    %c0_i32 = arith.constant 0 : i32
    %c0_i32_0 = arith.constant 0 : i32
    %c0_i32_1 = arith.constant 0 : i32
    %c0_i32_2 = arith.constant 0 : i32
    return %arg0, %c0_i32, %c0_i32_0, %c0_i32_1 : i32, i32, i32, i32
  }
  func.func @transform_1(%arg0: i32) -> (i32, i32, i32, i32) {
    %c0_i32 = arith.constant 0 : i32
    %c0_i32_0 = arith.constant 0 : i32
    %c0_i32_1 = arith.constant 0 : i32
    %c0_i32_2 = arith.constant 0 : i32
    return %arg0, %c0_i32, %c0_i32_0, %c0_i32_1 : i32, i32, i32, i32
  }
  func.func @transform_2(%arg0: i32) -> (i32, i32, i32) {
    %c0_i32 = arith.constant 0 : i32
    %c0_i32_0 = arith.constant 0 : i32
    %c0_i32_1 = arith.constant 0 : i32
    %c0_i32_2 = arith.constant 0 : i32
    return %c0_i32, %c0_i32_0, %c0_i32_1 : i32, i32, i32
  }
  func.func @transform_3(%arg0: i32) -> (i32, i32) {
    %c0_i32 = arith.constant 0 : i32
    %c0_i32_0 = arith.constant 0 : i32
    return %arg0, %c0_i32 : i32, i32
  }
  func.func @transform_4(%arg0: i32) -> (i32, i32) {
    %c0_i32 = arith.constant 0 : i32
    %c0_i32_0 = arith.constant 0 : i32
    return %arg0, %c0_i32 : i32, i32
  }
  func.func @transform_5(%arg0: i32) -> (i32, i32, i32) {
    %c0_i32 = arith.constant 0 : i32
    %c0_i32_0 = arith.constant 0 : i32
    %c0_i32_1 = arith.constant 0 : i32
    return %arg0, %c0_i32, %c0_i32_0 : i32, i32, i32
  }
  func.func @transform_6(%arg0: i32) -> (i32, i32, i32) {
    %c0_i32 = arith.constant 0 : i32
    %c0_i32_0 = arith.constant 0 : i32
    %c0_i32_1 = arith.constant 0 : i32
    return %arg0, %c0_i32, %c0_i32_0 : i32, i32, i32
  }
}

module attributes {stable_mosaic.version = 11 : i64} {
  func.func @_bn_relu_pool_kernel(%arg0: i32, %arg1: memref<1x16x8x128xbf16, #tpu.memory_space<vmem>>, %arg2: memref<1x16x8x128xbf16, #tpu.memory_space<vmem>>, %arg3: memref<1x128xf32, #tpu.memory_space<vmem>>, %arg4: memref<1x128xf32, #tpu.memory_space<vmem>>, %arg5: memref<1x8x8x128xf32, #tpu.memory_space<vmem>>) attributes {dimension_semantics = [#tpu.dimension_semantics<parallel>], iteration_bounds = array<i64: 2>, scalar_prefetch = 0 : i64, scratch_operands = 0 : i64, tpu.core_type = #tpu.core_type<tc>, window_params = [{transform_indices = @transform_0, window_bounds = array<i64: 1, 16, 8, 128>}, {transform_indices = @transform_1, window_bounds = array<i64: 1, 16, 8, 128>}, {pipeline_mode = #tpu.pipeline_mode<synchronous>, transform_indices = @transform_2, window_bounds = array<i64: 1, 128>}, {pipeline_mode = #tpu.pipeline_mode<synchronous>, transform_indices = @transform_3, window_bounds = array<i64: 1, 128>}, {transform_indices = @transform_4, window_bounds = array<i64: 1, 8, 8, 128>}]} {
    %c0 = arith.constant 0 : index
    %c0_0 = arith.constant 0 : index
    %0 = vector.load %arg3[%c0, %c0_0] : memref<1x128xf32, #tpu.memory_space<vmem>>, vector<1x128xf32>
    %c0_1 = arith.constant 0 : index
    %c0_2 = arith.constant 0 : index
    %1 = vector.load %arg4[%c0_1, %c0_2] : memref<1x128xf32, #tpu.memory_space<vmem>>, vector<1x128xf32>
    %c0_3 = arith.constant 0 : index
    %c0_4 = arith.constant 0 : index
    %c0_5 = arith.constant 0 : index
    %c0_6 = arith.constant 0 : index
    %2 = vector.load %arg1[%c0_3, %c0_4, %c0_5, %c0_6] : memref<1x16x8x128xbf16, #tpu.memory_space<vmem>>, vector<1x16x8x128xbf16>
    %3 = arith.extf %2 : vector<1x16x8x128xbf16> to vector<1x16x8x128xf32>
    %4 = vector.shape_cast %0 : vector<1x128xf32> to vector<1x1x1x128xf32>
    %5 = vector.broadcast %4 : vector<1x1x1x128xf32> to vector<1x16x8x128xf32>
    %6 = arith.mulf %3, %5 : vector<1x16x8x128xf32>
    %7 = vector.shape_cast %1 : vector<1x128xf32> to vector<1x1x1x128xf32>
    %8 = vector.broadcast %7 : vector<1x1x1x128xf32> to vector<1x16x8x128xf32>
    %9 = arith.addf %6, %8 : vector<1x16x8x128xf32>
    %cst = arith.constant 0.000000e+00 : f32
    %10 = vector.broadcast %cst : f32 to vector<1x16x8x128xf32>
    %11 = arith.maximumf %9, %10 : vector<1x16x8x128xf32>
    %c0_7 = arith.constant 0 : index
    %c0_8 = arith.constant 0 : index
    %c0_9 = arith.constant 0 : index
    %c0_10 = arith.constant 0 : index
    %12 = vector.load %arg2[%c0_7, %c0_8, %c0_9, %c0_10] : memref<1x16x8x128xbf16, #tpu.memory_space<vmem>>, vector<1x16x8x128xbf16>
    %13 = arith.extf %12 : vector<1x16x8x128xbf16> to vector<1x16x8x128xf32>
    %14 = vector.shape_cast %0 : vector<1x128xf32> to vector<1x1x1x128xf32>
    %15 = vector.broadcast %14 : vector<1x1x1x128xf32> to vector<1x16x8x128xf32>
    %16 = arith.mulf %13, %15 : vector<1x16x8x128xf32>
    %17 = vector.shape_cast %1 : vector<1x128xf32> to vector<1x1x1x128xf32>
    %18 = vector.broadcast %17 : vector<1x1x1x128xf32> to vector<1x16x8x128xf32>
    %19 = arith.addf %16, %18 : vector<1x16x8x128xf32>
    %cst_11 = arith.constant 0.000000e+00 : f32
    %20 = vector.broadcast %cst_11 : f32 to vector<1x16x8x128xf32>
    %21 = arith.maximumf %19, %20 : vector<1x16x8x128xf32>
    %22 = arith.maximumf %11, %21 : vector<1x16x8x128xf32>
    %23 = vector.shape_cast %22 : vector<1x16x8x128xf32> to vector<1x8x2x8x128xf32>
    %cst_12 = arith.constant dense<0xFF800000> : vector<1x8x8x128xf32>
    %24 = vector.multi_reduction <maximumf>, %23, %cst_12 [2] : vector<1x8x2x8x128xf32> to vector<1x8x8x128xf32>
    %c0_13 = arith.constant 0 : index
    %c0_14 = arith.constant 0 : index
    %c0_15 = arith.constant 0 : index
    %c0_16 = arith.constant 0 : index
    %25 = vector.load %arg5[%c0_13, %c0_14, %c0_15, %c0_16] : memref<1x8x8x128xf32, #tpu.memory_space<vmem>>, vector<1x8x8x128xf32>
    tpu.vector_store %arg5[%c0_13, %c0_14, %c0_15, %c0_16], %24 {strides = array<i32>} : memref<1x8x8x128xf32, #tpu.memory_space<vmem>>, vector<1x8x8x128xf32>,
    return
  }
  func.func @transform_0(%arg0: i32) -> (i32, i32, i32, i32) {
    %c0_i32 = arith.constant 0 : i32
    %c0_i32_0 = arith.constant 0 : i32
    %c0_i32_1 = arith.constant 0 : i32
    %c0_i32_2 = arith.constant 0 : i32
    return %arg0, %c0_i32, %c0_i32_0, %c0_i32_1 : i32, i32, i32, i32
  }
  func.func @transform_1(%arg0: i32) -> (i32, i32, i32, i32) {
    %c0_i32 = arith.constant 0 : i32
    %c0_i32_0 = arith.constant 0 : i32
    %c0_i32_1 = arith.constant 0 : i32
    %c0_i32_2 = arith.constant 0 : i32
    return %arg0, %c0_i32, %c0_i32_0, %c0_i32_1 : i32, i32, i32, i32
  }
  func.func @transform_2(%arg0: i32) -> (i32, i32) {
    %c0_i32 = arith.constant 0 : i32
    %c0_i32_0 = arith.constant 0 : i32
    %c0_i32_1 = arith.constant 0 : i32
    return %c0_i32, %c0_i32_0 : i32, i32
  }
  func.func @transform_3(%arg0: i32) -> (i32, i32) {
    %c0_i32 = arith.constant 0 : i32
    %c0_i32_0 = arith.constant 0 : i32
    %c0_i32_1 = arith.constant 0 : i32
    return %c0_i32, %c0_i32_0 : i32, i32
  }
  func.func @transform_4(%arg0: i32) -> (i32, i32, i32, i32) {
    %c0_i32 = arith.constant 0 : i32
    %c0_i32_0 = arith.constant 0 : i32
    %c0_i32_1 = arith.constant 0 : i32
    %c0_i32_2 = arith.constant 0 : i32
    return %arg0, %c0_i32, %c0_i32_0, %c0_i32_1 : i32, i32, i32, i32
  }
}

</mosaic_0001>

<bundles_post_ra>
// kernel: conv_block_forward.3
= control target key start
LH: loop header
LB: loop body
LE: loop exit
PB: predicated region body
PF: predicated region fallthrough
CT: control target
= control target key end

     0   :  { %s622_s15 = smov 0   ;;  %s751_s0 = inlined_call_operand.vmem [shape: bf16[2,16,8,128], index: 0, kind: input, shape index: {}]   ;;  %s752_s1 = inlined_call_operand.vmem [shape: bf16[2,16,8,128], index: 1, kind: input, shape index: {}]   ;;  %s753_s2 = inlined_call_operand.vmem [shape: f32[1,128], index: 2, kind: input, shape index: {}]   ;;  %s754_s3 = inlined_call_operand.vmem [shape: f32[1,128], index: 3, kind: input, shape index: {}]   ;;  %s755_s4 = inlined_call_operand.vmem [shape: f32[2,8,8,128], index: 4, kind: output, shape index: {}]  }
   0x1 LB: > { %s485_s16 = sadd.s32 4294967295, %s595_s15   ;;  %p489_p0 = scmp.ge.s32.totalorder %s595_s15, 1  ;;  %s595_s15 = sphi %s622_s15, %s14_s15  }
   0x2   : > { %p172_p1 = scmp.lt.s32.totalorder %s595_s15, 3 }
   0x4   : > { %p173_p2 = pnand %p489_p0, %p172_p1 }
   0x5   : > { %p203_p3 = scmp.lt.s32.totalorder (!%p173_p2), %s485_s16, 1 }
   0x6   : > { %176 = sbr.rel (%p173_p2) target bundleno = 60 (0x3c), region = 36 }
   0xb   : > { %s757_s16 = smov (!%p203_p3, %s485_s16), 1  ;;  %v647_v0 = vld [vmem:[%s753_s2] ss:$0 sm:$0xff] }
   0xc   : > { %s630_s17 = sshll.u32 %s757_s16, 6  ;;  %v655_v6 = vld [vmem:[%s754_s3] ss:$0 sm:$0xff] }
   0xd   : > { %s636_s20 = scalar_lea.vmem %s751_s0, %s630_s17  ;;  %s642_s23 = scalar_lea.vmem %s752_s1, %s630_s17 }
   0xe   : > { %v502_v1 = vld [vmem:[%s636_s20] sm:$0xff]   ;;  %v565_v3 = vld [vmem:[%s636_s20 + $0x8] sm:$0xff]   ;;  %v566_v30 = vld [vmem:[%s636_s20 + $0x10] sm:$0xff]   ;;  %s681_s30 = scalar_lea.vmem %s755_s4, %s630_s17 }
   0xf   : > { %v534_v2 = vld [vmem:[%s642_s23] sm:$0xff]   ;;  %v503_v4 = vunpack.c.l.bf16 %v502_v1  ;;  %v504_v5 = vunpack.c.h.bf16 %v502_v1  ;;  %v572_v9 = vld [vmem:[%s642_s23 + $0x8] sm:$0xff]   ;;  %v507_v10 = vunpack.c.l.bf16 %v565_v3  ;;  %v508_v11 = vunpack.c.h.bf16 %v565_v3  ;;  %v573_v35 = vld [vmem:[%s642_s23 + $0x10] sm:$0xff]  }
  0x10   : > { %v535_v7 = vunpack.c.l.bf16 %v534_v2  ;;  %v536_v8 = vunpack.c.h.bf16 %v534_v2  ;;  %v539_v12 = vunpack.c.l.bf16 %v572_v9  ;;  %v540_v13 = vunpack.c.h.bf16 %v572_v9  ;;  %v567_v40 = vld [vmem:[%s636_s20 + $0x18] sm:$0xff]   ;;  %v568_v3 = vld [vmem:[%s636_s20 + $0x20] sm:$0xff]  }
  0x11   : > { %v255_v14 = vmul.f32 %v647_v0, %v503_v4  ;;  %v256_v15 = vmul.f32 %v647_v0, %v504_v5  ;;  %v257_v18 = vmul.f32 %v647_v0, %v507_v10  ;;  %v258_v19 = vmul.f32 %v647_v0, %v508_v11  ;;  %v574_v49 = vld [vmem:[%s642_s23 + $0x18] sm:$0xff]  }
  0x12   : > { %v338_v16 = vmul.f32 %v647_v0, %v535_v7  ;;  %v339_v17 = vmul.f32 %v647_v0, %v536_v8  ;;  %v340_v20 = vmul.f32 %v647_v0, %v539_v12  ;;  %v341_v21 = vmul.f32 %v647_v0, %v540_v13  ;;  %v575_v13 = vld [vmem:[%s642_s23 + $0x20] sm:$0xff]  }
  0x13   : > { %v274_v22 = vadd.f32 %v655_v6, %v255_v14  ;;  %v275_v23 = vadd.f32 %v655_v6, %v256_v15  ;;  %v276_v26 = vadd.f32 %v655_v6, %v257_v18  ;;  %v277_v27 = vadd.f32 %v655_v6, %v258_v19  ;;  %v569_v18 = vld [vmem:[%s636_s20 + $0x28] sm:$0xff]  }
  0x14   : > { %v354_v24 = vadd.f32 %v655_v6, %v338_v16  ;;  %v355_v25 = vadd.f32 %v655_v6, %v339_v17  ;;  %v356_v28 = vadd.f32 %v655_v6, %v340_v20  ;;  %v357_v29 = vadd.f32 %v655_v6, %v341_v21 }
  0x15   : > { %v290_v31 = vmax.f32 %v274_v22, 0.0  ;;  %v291_v32 = vmax.f32 %v275_v23, 0.0  ;;  %v292_v36 = vmax.f32 %v276_v26, 0.0  ;;  %v293_v37 = vmax.f32 %v277_v27, 0.0 }
  0x16   : > { %v370_v33 = vmax.f32 %v354_v24, 0.0  ;;  %v371_v34 = vmax.f32 %v355_v25, 0.0  ;;  %v372_v38 = vmax.f32 %v356_v28, 0.0  ;;  %v373_v39 = vmax.f32 %v357_v29, 0.0 }
  0x17   : > { %v511_v43 = vunpack.c.l.bf16 %v566_v30  ;;  %v512_v44 = vunpack.c.h.bf16 %v566_v30  ;;  %v543_v47 = vunpack.c.l.bf16 %v573_v35  ;;  %v544_v48 = vunpack.c.h.bf16 %v573_v35 }
  0x18   : > { %v386_v41 = vmax.f32 %v290_v31, %v370_v33  ;;  %v387_v42 = vmax.f32 %v291_v32, %v371_v34  ;;  %v388_v45 = vmax.f32 %v292_v36, %v372_v38  ;;  %v389_v46 = vmax.f32 %v293_v37, %v373_v39  ;;  %v576_v31 = vld [vmem:[%s642_s23 + $0x28] sm:$0xff]  }
  0x19   : > { %v259_v51 = vmul.f32 %v647_v0, %v511_v43  ;;  %v260_v52 = vmul.f32 %v647_v0, %v512_v44  ;;  %v515_v53 = vunpack.c.l.bf16 %v567_v40  ;;  %v342_v55 = vmul.f32 %v647_v0, %v543_v47 }
  0x1a   : > { %v402_v50 = vmax.f32 %v386_v41, %v387_v42  ;;  %v403_v54 = vmax.f32 %v388_v45, %v389_v46  ;;  %v343_v56 = vmul.f32 %v647_v0, %v544_v48  ;;  %v516_v57 = vunpack.c.h.bf16 %v567_v40  ;;  %v570_v40 = vld [vmem:[%s636_s20 + $0x30] sm:$0xff]  }
  0x1b   : > { %v278_v58 = vadd.f32 %v655_v6, %v259_v51  ;;  %v279_v59 = vadd.f32 %v655_v6, %v260_v52  ;;  %v261_v60 = vmul.f32 %v647_v0, %v515_v53  ;;  %v547_v61 = vunpack.c.l.bf16 %v574_v49  ;;  %v577_v53 = vld [vmem:[%s642_s23 + $0x30] sm:$0xff]  }
  0x1c   : > { %410 = vst [vmem:[%s681_s30] sm:$0xff] %v402_v50  ;;  %v358_v62 = vadd.f32 %v655_v6, %v342_v55  ;;  %v359_v63 = vadd.f32 %v655_v6, %v343_v56  ;;  %v262_v1 = vmul.f32 %v647_v0, %v516_v57  ;;  %v548_v2 = vunpack.c.h.bf16 %v574_v49 }
  0x1d   : > { %411 = vst [vmem:[%s681_s30 + $0x8] sm:$0xff] %v403_v54  ;;  %v294_v4 = vmax.f32 %v278_v58, 0.0  ;;  %v295_v5 = vmax.f32 %v279_v59, 0.0  ;;  %v280_v7 = vadd.f32 %v655_v6, %v261_v60  ;;  %v344_v8 = vmul.f32 %v647_v0, %v547_v61 }
  0x1e   : > { %v374_v9 = vmax.f32 %v358_v62, 0.0  ;;  %v375_v10 = vmax.f32 %v359_v63, 0.0  ;;  %v281_v11 = vadd.f32 %v655_v6, %v262_v1  ;;  %v345_v12 = vmul.f32 %v647_v0, %v548_v2  ;;  %v571_v62 = vld [vmem:[%s636_s20 + $0x38] sm:$0xff]  }
  0x1f   : > { %v296_v14 = vmax.f32 %v280_v7, 0.0  ;;  %v360_v15 = vadd.f32 %v655_v6, %v344_v8  ;;  %v519_v16 = vunpack.c.l.bf16 %v568_v3  ;;  %v520_v17 = vunpack.c.h.bf16 %v568_v3 }
  0x20   : > { %v390_v19 = vmax.f32 %v294_v4, %v374_v9  ;;  %v391_v20 = vmax.f32 %v295_v5, %v375_v10  ;;  %v297_v21 = vmax.f32 %v281_v11, 0.0  ;;  %v361_v22 = vadd.f32 %v655_v6, %v345_v12 }
  0x21   : > { %v376_v23 = vmax.f32 %v360_v15, 0.0  ;;  %v263_v24 = vmul.f32 %v647_v0, %v519_v16  ;;  %v264_v25 = vmul.f32 %v647_v0, %v520_v17  ;;  %v551_v26 = vunpack.c.l.bf16 %v575_v13 }
  0x22   : > { %v404_v27 = vmax.f32 %v390_v19, %v391_v20  ;;  %v377_v28 = vmax.f32 %v361_v22, 0.0  ;;  %v552_v29 = vunpack.c.h.bf16 %v575_v13  ;;  %v523_v30 = vunpack.c.l.bf16 %v569_v18  ;;  %v578_v13 = vld [vmem:[%s642_s23 + $0x38] sm:$0xff]  }
  0x23   : > { %v392_v32 = vmax.f32 %v296_v14, %v376_v23  ;;  %v282_v33 = vadd.f32 %v655_v6, %v263_v24  ;;  %v283_v34 = vadd.f32 %v655_v6, %v264_v25  ;;  %v346_v35 = vmul.f32 %v647_v0, %v551_v26 }
  0x24   : > { %412 = vst [vmem:[%s681_s30 + $0x10] sm:$0xff] %v404_v27  ;;  %v393_v36 = vmax.f32 %v297_v21, %v377_v28  ;;  %v347_v37 = vmul.f32 %v647_v0, %v552_v29  ;;  %v524_v38 = vunpack.c.h.bf16 %v569_v18  ;;  %v265_v39 = vmul.f32 %v647_v0, %v523_v30 }
  0x25   : > { %v298_v41 = vmax.f32 %v282_v33, 0.0  ;;  %v299_v42 = vmax.f32 %v283_v34, 0.0  ;;  %v362_v43 = vadd.f32 %v655_v6, %v346_v35  ;;  %v555_v44 = vunpack.c.l.bf16 %v576_v31 }
  0x26   : > { %v405_v45 = vmax.f32 %v392_v32, %v393_v36  ;;  %v363_v46 = vadd.f32 %v655_v6, %v347_v37  ;;  %v266_v47 = vmul.f32 %v647_v0, %v524_v38  ;;  %v284_v48 = vadd.f32 %v655_v6, %v265_v39 }
  0x27   : > { %v378_v49 = vmax.f32 %v362_v43, 0.0  ;;  %v556_v50 = vunpack.c.h.bf16 %v576_v31  ;;  %v348_v51 = vmul.f32 %v647_v0, %v555_v44  ;;  %v527_v52 = vunpack.c.l.bf16 %v570_v40 }
  0x28   : > { %413 = vst [vmem:[%s681_s30 + $0x18] sm:$0xff] %v405_v45  ;;  %v379_v54 = vmax.f32 %v363_v46, 0.0  ;;  %v285_v55 = vadd.f32 %v655_v6, %v266_v47  ;;  %v300_v56 = vmax.f32 %v284_v48, 0.0  ;;  %v528_v57 = vunpack.c.h.bf16 %v570_v40 }
  0x29   : > { %v394_v58 = vmax.f32 %v298_v41, %v378_v49  ;;  %v349_v59 = vmul.f32 %v647_v0, %v556_v50  ;;  %v364_v60 = vadd.f32 %v655_v6, %v348_v51  ;;  %v267_v61 = vmul.f32 %v647_v0, %v527_v52 }
  0x2a   : > { %v395_v63 = vmax.f32 %v299_v42, %v379_v54  ;;  %v301_v1 = vmax.f32 %v285_v55, 0.0  ;;  %v268_v2 = vmul.f32 %v647_v0, %v528_v57  ;;  %v559_v3 = vunpack.c.l.bf16 %v577_v53 }
  0x2b   : > { %v365_v4 = vadd.f32 %v655_v6, %v349_v59  ;;  %v380_v5 = vmax.f32 %v364_v60, 0.0  ;;  %v286_v7 = vadd.f32 %v655_v6, %v267_v61  ;;  %v560_v8 = vunpack.c.h.bf16 %v577_v53 }
  0x2c   : > { %v406_v9 = vmax.f32 %v394_v58, %v395_v63  ;;  %v287_v10 = vadd.f32 %v655_v6, %v268_v2  ;;  %v350_v11 = vmul.f32 %v647_v0, %v559_v3  ;;  %v531_v12 = vunpack.c.l.bf16 %v571_v62 }
  0x2d   : > { %v381_v14 = vmax.f32 %v365_v4, 0.0  ;;  %v396_v15 = vmax.f32 %v300_v56, %v380_v5  ;;  %v302_v16 = vmax.f32 %v286_v7, 0.0  ;;  %v351_v17 = vmul.f32 %v647_v0, %v560_v8 }
  0x2e   : > { %414 = vst [vmem:[%s681_s30 + $0x20] sm:$0xff] %v406_v9  ;;  %v303_v18 = vmax.f32 %v287_v10, 0.0  ;;  %v366_v19 = vadd.f32 %v655_v6, %v350_v11  ;;  %v532_v20 = vunpack.c.h.bf16 %v571_v62  ;;  %v269_v21 = vmul.f32 %v647_v0, %v531_v12 }
  0x2f   : > { %v397_v22 = vmax.f32 %v301_v1, %v381_v14  ;;  %v367_v23 = vadd.f32 %v655_v6, %v351_v17  ;;  %v563_v24 = vunpack.c.l.bf16 %v578_v13  ;;  %v564_v25 = vunpack.c.h.bf16 %v578_v13 }
  0x30   : > { %v382_v26 = vmax.f32 %v366_v19, 0.0  ;;  %v270_v27 = vmul.f32 %v647_v0, %v532_v20  ;;  %v288_v28 = vadd.f32 %v655_v6, %v269_v21 }
  0x31   : > { %v407_v29 = vmax.f32 %v396_v15, %v397_v22  ;;  %v383_v30 = vmax.f32 %v367_v23, 0.0  ;;  %v352_v31 = vmul.f32 %v647_v0, %v563_v24  ;;  %v353_v32 = vmul.f32 %v647_v0, %v564_v25 }
  0x32   : > { %v398_v33 = vmax.f32 %v302_v16, %v382_v26  ;;  %v289_v34 = vadd.f32 %v655_v6, %v270_v27  ;;  %v304_v36 = vmax.f32 %v288_v28, 0.0 }
  0x33   : > { %415 = vst [vmem:[%s681_s30 + $0x28] sm:$0xff] %v407_v29  ;;  %v399_v35 = vmax.f32 %v303_v18, %v383_v30  ;;  %v368_v37 = vadd.f32 %v655_v6, %v352_v31  ;;  %v369_v38 = vadd.f32 %v655_v6, %v353_v32 }
  0x34   : > { %v305_v39 = vmax.f32 %v289_v34, 0.0 }
  0x35   : > { %v408_v40 = vmax.f32 %v398_v33, %v399_v35  ;;  %v384_v41 = vmax.f32 %v368_v37, 0.0  ;;  %v385_v42 = vmax.f32 %v369_v38, 0.0 }
  0x37   : > { %416 = vst [vmem:[%s681_s30 + $0x30] sm:$0xff] %v408_v40  ;;  %v400_v43 = vmax.f32 %v304_v36, %v384_v41  ;;  %v401_v44 = vmax.f32 %v305_v39, %v385_v42 }
  0x39   : > { %v409_v45 = vmax.f32 %v400_v43, %v401_v44 }
  0x3b   : > { %417 = vst [vmem:[%s681_s30 + $0x38] sm:$0xff] %v409_v45 }
  0x3c PF: > { %s14_s15 = sadd.s32 1, %s595_s15  }
  0x3d   : > { %p11_p4 = scmp.ge.s32.totalorder %s14_s15, 4  }
  0x3f   :  { %13 = sbr.rel (!%p11_p4) target bundleno = 1 (0x1), region = 69 }

// kernel: conv_block_forward.2
= control target key start
LH: loop header
LB: loop body
LE: loop exit
PB: predicated region body
PF: predicated region fallthrough
CT: control target
= control target key end

     0   :  { %s2104_s21 = smov 0   ;;  %s2566_s0 = inlined_call_operand.vmem [shape: bf16[2,18,8,12], index: 0, kind: input, shape index: {}]   ;;  %s2567_s1 = inlined_call_operand.vmem [shape: bf16[2,18,8,12], index: 1, kind: input, shape index: {}]   ;;  %s2568_s2 = inlined_call_operand.vmem [shape: bf16[3,12,128], index: 2, kind: input, shape index: {}]   ;;  %s2569_s3 = inlined_call_operand.vmem [shape: bf16[256,128], index: 3, kind: output, shape index: {0}]   ;;  %s2570_s4 = inlined_call_operand.vmem [shape: bf16[256,128], index: 4, kind: output, shape index: {1}]   ;;  %s2571_s5 = inlined_call_operand.vmem [shape: f32[2,1,128], index: 5, kind: output, shape index: {2}]   ;;  %s2572_s6 = inlined_call_operand.vmem [shape: f32[2,1,128], index: 6, kind: output, shape index: {3}]  }
   0x1 LB: > { %s2110_s22 = sadd.s32 4294967295, %s2067_s21   ;;  %p1557_p0 = scmp.ge.s32.totalorder %s2067_s21, 1  ;;  %s2067_s21 = sphi %s2104_s21, %s17_s21  }
   0x2   : > { %p229_p1 = scmp.lt.s32.totalorder %s2067_s21, 3 }
   0x4   : > { %p230_p2 = pnand %p1557_p0, %p229_p1 }
   0x5   : > { %p275_p3 = scmp.lt.s32.totalorder (!%p230_p2), %s2110_s22, 1  ;;  %s1560_s10 = sshll.u32 (!%p230_p2), %s2110_s22, 4 }
   0x6   : > { %233 = sbr.rel (%p230_p2) target bundleno = 410 (0x19a), region = 32  ;;  %p286_p4 = scmp.lt.s32.totalorder (!%p230_p2), %s1560_s10, 31 }
   0xb   : > { %v1616_v0 = vld [vmem:[%s2568_s2 + $0x8] sm:$0xf]  ;;  %v1919_v1 = vld [vmem:[%s2568_s2 + $0x8] sm:$0x30]  ;;  %vm412_vm0 = vcmask 1045504   ;;  %s2128_s7 = scalar_select %p275_p3, %s2110_s22, 1 }
   0xc   : > { %v1617_v2 = vor.u32 %v1919_v1, %v1616_v0  ;;  %v1660_v3 = vld [vmem:[%s2568_s2] sm:$0xf]  ;;  %v1910_v4 = vld [vmem:[%s2568_s2] sm:$0x30]  ;;  %v1784_v6 = vld [vmem:[%s2568_s2 + $0x8] sm:$0xf] }
   0xd   : > { %v1661_v5 = vor.u32 %v1910_v4, %v1660_v3  ;;  %v1946_v7 = vld [vmem:[%s2568_s2 + $0x8] sm:$0x30]  ;;  %v1722_v10 = vld [vmem:[%s2568_s2 + $0x10] sm:$0xf]  ;;  %v1928_v11 = vld [vmem:[%s2568_s2 + $0x10] sm:$0x30]  ;;  %s299_s19 = scalar_lea.vmem %s2571_s5, %s2128_s7  ;;  %s302_s24 = scalar_lea.vmem %s2572_s6, %s2128_s7 }
   0xe   : > { %v414_v8 = vsel %vm412_vm0, %v1617_v2, 0  ;;  %v1785_v9 = vor.u32 %v1946_v7, %v1784_v6  ;;  %s2052_s16 = smul.u32 72, %s2128_s7  ;;  %v1723_v13 = vor.u32 %v1928_v11, %v1722_v10  ;;  %v1828_v14 = vld [vmem:[%s2568_s2] sm:$0xf]  ;;  %v1937_v15 = vld [vmem:[%s2568_s2] sm:$0x30] }
   0xf   : > { %423 = vmatpush.bf16.msra.mxu0 %v414_v8  ;;  %2050 = vmatpush.bf16.msra.mxu2 %v414_v8  ;;  %v535_v12 = vsel %vm412_vm0, %v1661_v5, 0  ;;  %v1829_v17 = vor.u32 %v1937_v15, %v1828_v14  ;;  %v1890_v18 = vld [vmem:[%s2568_s2 + $0x10] sm:$0xf]  ;;  %v1955_v19 = vld [vmem:[%s2568_s2 + $0x10] sm:$0x30]  ;;  %vm387_vm1 = vcmask 97280  }
  0x10   : > { %544 = vmatpush.bf16.msra.mxu1 %v535_v12  ;;  %2051 = vmatpush.bf16.msra.mxu3 %v535_v12  ;;  %v957_v16 = vsel %vm412_vm0, %v1785_v9, 0  ;;  %s2163_s29 = scalar_lea.vmem %s2566_s0, %s2052_s16  ;;  %v676_v20 = vsel %vm412_vm0, %v1723_v13, 0  ;;  %v1891_v21 = vor.u32 %v1955_v19, %v1890_v18  ;;  %s2205_s9 = scalar_lea.vmem %s2567_s1, %s2052_s16 }
  0x11   : > { %v1911_v22 = vld [vmem:[%s2163_s29 + $0x4] sm:$0xff]  ;;  %v1078_v25 = vsel %vm412_vm0, %v1829_v17, 0  ;;  %v1912_v28 = vld [vmem:[%s2163_s29 + $0xc] sm:$0xff]  ;;  %v1913_v32 = vld [vmem:[%s2163_s29 + $0x14] sm:$0xff]  ;;  %s2574_s10 = smov (!%p286_p4, %s1560_s10), 31 }
  0x12   : > { %v1915_v23 = vld [vmem:[%s2163_s29 + $0x24] sm:$0xff]  ;;  %v1218_v27 = vsel %vm412_vm0, %v1891_v21, 0  ;;  %1618 = vmatmul.msk.bf16.vlgmr.msra.gmra.mxu0 %vm387_vm1, %v1911_v22  ;;  %v1916_v29 = vld [vmem:[%s2163_s29 + $0x2c] sm:$0xff]  ;;  %v1917_v33 = vld [vmem:[%s2163_s29 + $0x34] sm:$0xff]  ;;  %s1561_s11 = sshll.u32 %s2574_s10, 2 }
  0x13   : > { %v1902_v24 = vld [vmem:[%s2163_s29] sm:$0xff]  ;;  %685 = vmatpush.bf16.msrb.mxu2 %v676_v20  ;;  %1087 = vmatpush.bf16.msrb.mxu0 %v1078_v25  ;;  %v1903_v30 = vld [vmem:[%s2163_s29 + $0x8] sm:$0xff]  ;;  %v1904_v34 = vld [vmem:[%s2163_s29 + $0x10] sm:$0xff]  ;;  %s2322_s13 = scalar_lea.vmem %s2569_s3, %s1561_s11  ;;  %s2334_s16 = scalar_lea.vmem %s2570_s4, %s1561_s11 }
  0x14   : > { %966 = vmatpush.bf16.msrb.mxu3 %v957_v16  ;;  %v1906_v26 = vld [vmem:[%s2163_s29 + $0x20] sm:$0xff]  ;;  %1622 = vmatmul.msk.bf16.vlgmr.msra.gmra.mxu2 %vm387_vm1, %v1915_v23  ;;  %v1907_v31 = vld [vmem:[%s2163_s29 + $0x28] sm:$0xff]  ;;  %v1908_v35 = vld [vmem:[%s2163_s29 + $0x30] sm:$0xff] }
  0x15   : > { %1662 = vmatmul.msk.bf16.vlgmr.msra.gmra.mxu1 %vm387_vm1, %v1902_v24  ;;  %1666 = vmatmul.msk.bf16.vlgmr.msra.gmra.mxu3 %vm387_vm1, %v1906_v26  ;;  %v1914_v36 = vld [vmem:[%s2163_s29 + $0x1c] sm:$0xff]  ;;  %v1920_v40 = vld [vmem:[%s2163_s29 + $0x8] sm:$0xff]  ;;  %v1921_v44 = vld [vmem:[%s2163_s29 + $0x10] sm:$0xff] }
  0x16   : > { %1227 = vmatpush.bf16.msrb.mxu1 %v1218_v27  ;;  %v1918_v37 = vld [vmem:[%s2163_s29 + $0x3c] sm:$0xff]  ;;  %v1938_v42 = vld [vmem:[%s2205_s9 + $0x4] sm:$0xff]  ;;  %v1939_v46 = vld [vmem:[%s2205_s9 + $0xc] sm:$0xff] }
  0x17   : > { %v1905_v38 = vld [vmem:[%s2163_s29 + $0x18] sm:$0xff]  ;;  %v1929_v41 = vld [vmem:[%s2205_s9] sm:$0xff]  ;;  %v1947_v43 = vld [vmem:[%s2205_s9 + $0x8] sm:$0xff] }
  0x18   : > { %v1909_v39 = vld [vmem:[%s2163_s29 + $0x38] sm:$0xff]  ;;  %v1930_v45 = vld [vmem:[%s2205_s9 + $0x8] sm:$0xff]  ;;  %v1948_v47 = vld [vmem:[%s2205_s9 + $0x10] sm:$0xff] }
  0x19   : > { %v1922_v48 = vld [vmem:[%s2163_s29 + $0x18] sm:$0xff]  ;;  %v1931_v49 = vld [vmem:[%s2205_s9 + $0x10] sm:$0xff]  ;;  %v1923_v52 = vld [vmem:[%s2163_s29 + $0x20] sm:$0xff] }
  0x1a   : > { %v1940_v50 = vld [vmem:[%s2205_s9 + $0x14] sm:$0xff]  ;;  %v1941_v54 = vld [vmem:[%s2205_s9 + $0x1c] sm:$0xff]  ;;  %v1924_v56 = vld [vmem:[%s2163_s29 + $0x28] sm:$0xff] }
  0x1b   : > { %v1949_v51 = vld [vmem:[%s2205_s9 + $0x18] sm:$0xff]  ;;  %v1950_v55 = vld [vmem:[%s2205_s9 + $0x20] sm:$0xff]  ;;  %v1951_v60 = vld [vmem:[%s2205_s9 + $0x28] sm:$0xff] }
  0x1c   : > { %v1932_v53 = vld [vmem:[%s2205_s9 + $0x18] sm:$0xff]  ;;  %v1933_v57 = vld [vmem:[%s2205_s9 + $0x20] sm:$0xff]  ;;  %v1925_v6 = vld [vmem:[%s2163_s29 + $0x30] sm:$0xff] }
  0x1d   : > { %v1942_v59 = vld [vmem:[%s2205_s9 + $0x24] sm:$0xff]  ;;  %v1943_v10 = vld [vmem:[%s2205_s9 + $0x2c] sm:$0xff]  ;;  %v1926_v21 = vld [vmem:[%s2163_s29 + $0x38] sm:$0xff] }
  0x1e   : > { %v1934_v7 = vld [vmem:[%s2205_s9 + $0x28] sm:$0xff]  ;;  %v1952_v11 = vld [vmem:[%s2205_s9 + $0x30] sm:$0xff]  ;;  %v1953_v26 = vld [vmem:[%s2205_s9 + $0x38] sm:$0xff] }
  0x1f   : > { %v1935_v22 = vld [vmem:[%s2205_s9 + $0x30] sm:$0xff] }
  0x20   : > { %v1944_v25 = vld [vmem:[%s2205_s9 + $0x34] sm:$0xff] }
  0x22   : > { %1619 = vmatmul.msk.bf16.gmra.mxu0 %vm387_vm1, %v1912_v28 }
  0x24   : > { %1623 = vmatmul.msk.bf16.gmra.mxu2 %vm387_vm1, %v1916_v29 }
  0x25   : > { %1663 = vmatmul.msk.bf16.gmra.mxu1 %vm387_vm1, %v1903_v30  ;;  %1667 = vmatmul.msk.bf16.gmra.mxu3 %vm387_vm1, %v1907_v31 }
  0x32   : > { %1620 = vmatmul.msk.bf16.gmra.mxu0 %vm387_vm1, %v1913_v32 }
  0x34   : > { %1624 = vmatmul.msk.bf16.gmra.mxu2 %vm387_vm1, %v1917_v33 }
  0x35   : > { %1664 = vmatmul.msk.bf16.gmra.mxu1 %vm387_vm1, %v1904_v34  ;;  %1668 = vmatmul.msk.bf16.gmra.mxu3 %vm387_vm1, %v1908_v35 }
  0x42   : > { %1621 = vmatmul.msk.bf16.gmra.mxu0 %vm387_vm1, %v1914_v36  ;;  %v1927_v36 = vld [vmem:[%s2163_s29 + $0x40] sm:$0xff] }
  0x44   : > { %1625 = vmatmul.msk.bf16.gmra.mxu2 %vm387_vm1, %v1918_v37  ;;  %v1936_v37 = vld [vmem:[%s2205_s9 + $0x38] sm:$0xff] }
  0x45   : > { %1665 = vmatmul.msk.bf16.gmra.mxu1 %vm387_vm1, %v1905_v38  ;;  %1669 = vmatmul.msk.bf16.gmra.mxu3 %vm387_vm1, %v1909_v39 }
  0x52   : > { %1830 = vmatmul.msk.bf16.vlgmr.msrb.gmra.mxu0 %vm387_vm1, %v1929_v41  ;;  %v1954_v41 = vld [vmem:[%s2205_s9 + $0x40] sm:$0xff] }
  0x54   : > { %1724 = vmatmul.msk.bf16.vlgmr.msrb.gmra.mxu2 %vm387_vm1, %v1920_v40  ;;  %v1945_v40 = vld [vmem:[%s2205_s9 + $0x3c] sm:$0xff] }
  0x55   : > { %1786 = vmatmul.msk.bf16.vlgmr.msrb.gmra.mxu3 %vm387_vm1, %v1938_v42  ;;  %1892 = vmatmul.msk.bf16.vlgmr.msrb.gmra.mxu1 %vm387_vm1, %v1947_v43 }
  0x62   : > { %1831 = vmatmul.msk.bf16.gmra.mxu0 %vm387_vm1, %v1930_v45 }
  0x64   : > { %1725 = vmatmul.msk.bf16.gmra.mxu2 %vm387_vm1, %v1921_v44 }
  0x65   : > { %1787 = vmatmul.msk.bf16.gmra.mxu3 %vm387_vm1, %v1939_v46  ;;  %1893 = vmatmul.msk.bf16.gmra.mxu1 %vm387_vm1, %v1948_v47 }
  0x72   : > { %1832 = vmatmul.msk.bf16.gmra.mxu0 %vm387_vm1, %v1931_v49 }
  0x74   : > { %1726 = vmatmul.msk.bf16.gmra.mxu2 %vm387_vm1, %v1922_v48 }
  0x75   : > { %1788 = vmatmul.msk.bf16.gmra.mxu3 %vm387_vm1, %v1940_v50  ;;  %1894 = vmatmul.msk.bf16.gmra.mxu1 %vm387_vm1, %v1949_v51 }
  0x82   : > { %1833 = vmatmul.msk.bf16.gmra.mxu0 %vm387_vm1, %v1932_v53 }
  0x84   : > { %1727 = vmatmul.msk.bf16.gmra.mxu2 %vm387_vm1, %v1923_v52 }
  0x85   : > { %1789 = vmatmul.msk.bf16.gmra.mxu3 %vm387_vm1, %v1941_v54  ;;  %1895 = vmatmul.msk.bf16.gmra.mxu1 %vm387_vm1, %v1950_v55 }
  0x8f   : > { %v425_v58 = vpop.f32.mrf.mxu0 }
  0x92   : > { %v546_v61 = vpop.f32.mrf.mxu1  ;;  %1834 = vmatmul.msk.bf16.gmra.mxu0 %vm387_vm1, %v1933_v57 }
  0x93   : > { %v2243_v62 = vadd.f32 %v546_v61, %v425_v58 }
  0x94   : > { %1728 = vmatmul.msk.bf16.gmra.mxu2 %vm387_vm1, %v1924_v56 }
  0x95   : > { %1790 = vmatmul.msk.bf16.gmra.mxu3 %vm387_vm1, %v1942_v59  ;;  %1896 = vmatmul.msk.bf16.gmra.mxu1 %vm387_vm1, %v1951_v60 }
  0x97   : > { %v445_v63 = vpop.f32.mrf.mxu2  ;;  %v2251_v2 = vpop.f32.mrf.mxu0 }
  0x98   : > { %v566_v0 = vpop.f32.mrf.mxu3 }
  0x99   : > { %v2249_v1 = vadd.f32 %v566_v0, %v445_v63 }
  0x9a   : > { %v2253_v3 = vpop.f32.mrf.mxu1 }
  0x9b   : > { %v549_v58 = vadd.f32 %v2253_v3, %v2251_v2 }
  0x9f   : > { %v447_v4 = vpop.f32.mrf.mxu2  ;;  %v430_v9 = vpop.f32.mrf.mxu0 }
  0xa0   : > { %v568_v5 = vpop.f32.mrf.mxu3 }
  0xa1   : > { %v2257_v8 = vadd.f32 %v568_v5, %v447_v4 }
  0xa2   : > { %v551_v12 = vpop.f32.mrf.mxu1  ;;  %1835 = vmatmul.msk.bf16.gmra.mxu0 %vm387_vm1, %v1934_v7 }
  0xa3   : > { %v2261_v13 = vadd.f32 %v551_v12, %v430_v9 }
  0xa4   : > { %1729 = vmatmul.msk.bf16.gmra.mxu2 %vm387_vm1, %v1925_v6 }
  0xa5   : > { %1791 = vmatmul.msk.bf16.gmra.mxu3 %vm387_vm1, %v1943_v10  ;;  %1897 = vmatmul.msk.bf16.gmra.mxu1 %vm387_vm1, %v1952_v11 }
  0xa7   : > { %v450_v14 = vpop.f32.mrf.mxu2  ;;  %v2269_v17 = vpop.f32.mrf.mxu0 }
  0xa8   : > { %v571_v15 = vpop.f32.mrf.mxu3 }
  0xa9   : > { %v2267_v16 = vadd.f32 %v571_v15, %v450_v14 }
  0xaa   : > { %v2271_v18 = vpop.f32.mrf.mxu1 }
  0xab   : > { %v554_v14 = vadd.f32 %v2271_v18, %v2269_v17 }
  0xaf   : > { %v452_v19 = vpop.f32.mrf.mxu2  ;;  %v435_v24 = vpop.f32.mrf.mxu0 }
  0xb0   : > { %v573_v20 = vpop.f32.mrf.mxu3 }
  0xb1   : > { %v2275_v23 = vadd.f32 %v573_v20, %v452_v19 }
  0xb2   : > { %v556_v27 = vpop.f32.mrf.mxu1  ;;  %1836 = vmatmul.msk.bf16.gmra.mxu0 %vm387_vm1, %v1935_v22 }
  0xb3   : > { %v2279_v28 = vadd.f32 %v556_v27, %v435_v24 }
  0xb4   : > { %1730 = vmatmul.msk.bf16.gmra.mxu2 %vm387_vm1, %v1926_v21 }
  0xb5   : > { %1792 = vmatmul.msk.bf16.gmra.mxu3 %vm387_vm1, %v1944_v25  ;;  %1898 = vmatmul.msk.bf16.gmra.mxu1 %vm387_vm1, %v1953_v26 }
  0xb7   : > { %v455_v29 = vpop.f32.mrf.mxu2  ;;  %v2287_v32 = vpop.f32.mrf.mxu0 }
  0xb8   : > { %v576_v30 = vpop.f32.mrf.mxu3 }
  0xb9   : > { %v2285_v31 = vadd.f32 %v576_v30, %v455_v29 }
  0xba   : > { %v2289_v33 = vpop.f32.mrf.mxu1 }
  0xbf   : > { %v457_v34 = vpop.f32.mrf.mxu2  ;;  %v440_v39 = vpop.f32.mrf.mxu0 }
  0xc0   : > { %v578_v35 = vpop.f32.mrf.mxu3 }
  0xc1   : > { %v2293_v38 = vadd.f32 %v578_v35, %v457_v34 }
  0xc2   : > { %v561_v42 = vpop.f32.mrf.mxu1  ;;  %1837 = vmatmul.msk.bf16.gmra.mxu0 %vm387_vm1, %v1936_v37 }
  0xc3   : > { %v2297_v43 = vadd.f32 %v561_v42, %v440_v39 }
  0xc4   : > { %1731 = vmatmul.msk.bf16.gmra.mxu2 %vm387_vm1, %v1927_v36  ;;  %v559_v36 = vadd.f32 %v2289_v33, %v2287_v32 }
  0xc5   : > { %1793 = vmatmul.msk.bf16.gmra.mxu3 %vm387_vm1, %v1945_v40  ;;  %1899 = vmatmul.msk.bf16.gmra.mxu1 %vm387_vm1, %v1954_v41 }
  0xc7   : > { %v460_v44 = vpop.f32.mrf.mxu2  ;;  %v2305_v47 = vpop.f32.mrf.mxu0 }
  0xc8   : > { %v581_v45 = vpop.f32.mrf.mxu3 }
  0xc9   : > { %v2303_v46 = vadd.f32 %v581_v45, %v460_v44 }
  0xca   : > { %v2307_v48 = vpop.f32.mrf.mxu1 }
  0xcf   : > { %v462_v49 = vpop.f32.mrf.mxu2  ;;  %v1089_v52 = vpop.f32.mrf.mxu0 }
  0xd0   : > { %v583_v50 = vpop.f32.mrf.mxu3 }
  0xd1   : > { %v2309_v51 = vadd.f32 %v583_v50, %v462_v49 }
  0xd2   : > { %v1229_v53 = vpop.f32.mrf.mxu1 }
  0xd7   : > { %v687_v54 = vpop.f32.mrf.mxu2  ;;  %v1091_v56 = vpop.f32.mrf.mxu0 }
  0xd8   : > { %v968_v55 = vpop.f32.mrf.mxu3  ;;  %v2315_v61 = vadd.f32 %v687_v54, %v2243_v62 }
  0xd9   : > { %v1090_v59 = vadd.f32 %v1089_v52, %v968_v55 }
  0xda   : > { %v1231_v57 = vpop.f32.mrf.mxu1 }
  0xdb   : > { %v2326_v6 = vadd.f32 %v1229_v53, %v1090_v59 }
  0xdf   : > { %v689_v60 = vpop.f32.mrf.mxu2  ;;  %v1094_v5 = vpop.f32.mrf.mxu0 }
  0xe0   : > { %v2317_v63 = vadd.f32 %v689_v60, %v549_v58  ;;  %v970_v0 = vpop.f32.mrf.mxu3 }
  0xe1   : > { %v1092_v4 = vadd.f32 %v1091_v56, %v970_v0  ;;  %v564_v56 = vadd.f32 %v2307_v48, %v2305_v47 }
  0xe2   : > { %v1959_v2 = vpack.c.bf16 %v2317_v63, %v2315_v61  ;;  %v1234_v3 = vpop.f32.mrf.mxu1 }
  0xe3   : > { %v2328_v7 = vadd.f32 %v1231_v57, %v1092_v4 }
  0xe4   : > { %1960 = vst [vmem:[%s2322_s13] sm:$0xff] %v1959_v2  }
  0xe5   : > { %v1999_v62 = vpack.c.bf16 %v2328_v7, %v2326_v6 }
  0xe7   : > { %2000 = vst [vmem:[%s2334_s16] sm:$0xff] %v1999_v62   ;;  %v692_v9 = vpop.f32.mrf.mxu2  ;;  %v1096_v11 = vpop.f32.mrf.mxu0 }
  0xe8   : > { %v973_v10 = vpop.f32.mrf.mxu3  ;;  %v2342_v20 = vadd.f32 %v692_v9, %v2261_v13 }
  0xe9   : > { %v1095_v15 = vadd.f32 %v1094_v5, %v973_v10 }
  0xea   : > { %v1236_v12 = vpop.f32.mrf.mxu1 }
  0xeb   : > { %v2348_v29 = vadd.f32 %v1234_v3, %v1095_v15 }
  0xef   : > { %v694_v19 = vpop.f32.mrf.mxu2  ;;  %v1099_v25 = vpop.f32.mrf.mxu0 }
  0xf0   : > { %v2344_v21 = vadd.f32 %v694_v19, %v554_v14  ;;  %v975_v22 = vpop.f32.mrf.mxu3 }
  0xf1   : > { %v1097_v24 = vadd.f32 %v1096_v11, %v975_v22 }
  0xf2   : > { %v1964_v26 = vpack.c.bf16 %v2344_v21, %v2342_v20  ;;  %v1239_v27 = vpop.f32.mrf.mxu1 }
  0xf3   : > { %v2350_v30 = vadd.f32 %v1236_v12, %v1097_v24  ;;  %v743_v12 = vadd.f32 %v2317_v63, %v2315_v61 }
  0xf4   : > { %2036 = vst [vmem:[%s2322_s13 + $0x8] sm:$0xff] %v1964_v26  }
  0xf5   : > { %v2004_v17 = vpack.c.bf16 %v2350_v30, %v2348_v29  ;;  %v744_v19 = vadd.f32 %v743_v12, %v2342_v20 }
  0xf7   : > { %2043 = vst [vmem:[%s2334_s16 + $0x8] sm:$0xff] %v2004_v17   ;;  %v697_v13 = vpop.f32.mrf.mxu2  ;;  %v1101_v34 = vpop.f32.mrf.mxu0  ;;  %v745_v17 = vadd.f32 %v744_v19, %v2344_v21 }
  0xf8   : > { %v978_v18 = vpop.f32.mrf.mxu3  ;;  %v2359_v40 = vadd.f32 %v697_v13, %v2279_v28 }
  0xf9   : > { %v1100_v37 = vadd.f32 %v1099_v25, %v978_v18 }
  0xfa   : > { %v1241_v35 = vpop.f32.mrf.mxu1 }
  0xfb   : > { %v2365_v52 = vadd.f32 %v1239_v27, %v1100_v37 }
  0xff   : > { %v699_v39 = vpop.f32.mrf.mxu2  ;;  %v1104_v45 = vpop.f32.mrf.mxu0 }
 0x100   : > { %v2361_v41 = vadd.f32 %v699_v39, %v559_v36  ;;  %v980_v42 = vpop.f32.mrf.mxu3  ;;  %v746_v36 = vadd.f32 %v745_v17, %v2359_v40 }
 0x101   : > { %v1102_v44 = vadd.f32 %v1101_v34, %v980_v42 }
 0x102   : > { %v1969_v49 = vpack.c.bf16 %v2361_v41, %v2359_v40  ;;  %v1244_v50 = vpop.f32.mrf.mxu1 }
 0x103   : > { %v2367_v53 = vadd.f32 %v1241_v35, %v1102_v44 }
 0x104   : > { %2037 = vst [vmem:[%s2322_s13 + $0x10] sm:$0xff] %v1969_v49  }
 0x105   : > { %v2009_v32 = vpack.c.bf16 %v2367_v53, %v2365_v52 }
 0x107   : > { %2044 = vst [vmem:[%s2334_s16 + $0x10] sm:$0xff] %v2009_v32   ;;  %v702_v28 = vpop.f32.mrf.mxu2  ;;  %v1106_v54 = vpop.f32.mrf.mxu0 }
 0x108   : > { %v983_v33 = vpop.f32.mrf.mxu3  ;;  %v2376_v59 = vadd.f32 %v702_v28, %v2297_v43 }
 0x109   : > { %v1105_v57 = vadd.f32 %v1104_v45, %v983_v33 }
 0x10a   : > { %v1246_v55 = vpop.f32.mrf.mxu1 }
 0x10b   : > { %v2382_v62 = vadd.f32 %v1244_v50, %v1105_v57 }
 0x10f   : > { %v704_v58 = vpop.f32.mrf.mxu2  ;;  %v1109_v5 = vpop.f32.mrf.mxu0 }
 0x110   : > { %v2378_v60 = vadd.f32 %v704_v58, %v564_v56  ;;  %v985_v0 = vpop.f32.mrf.mxu3 }
 0x111   : > { %v1107_v4 = vadd.f32 %v1106_v54, %v985_v0 }
 0x112   : > { %v1974_v2 = vpack.c.bf16 %v2378_v60, %v2376_v59  ;;  %v1249_v3 = vpop.f32.mrf.mxu1 }
 0x113   : > { %v2384_v9 = vadd.f32 %v1246_v55, %v1107_v4 }
 0x114   : > { %2038 = vst [vmem:[%s2322_s13 + $0x18] sm:$0xff] %v1974_v2  }
 0x115   : > { %v2014_v47 = vpack.c.bf16 %v2384_v9, %v2382_v62 }
 0x117   : > { %2045 = vst [vmem:[%s2334_s16 + $0x18] sm:$0xff] %v2014_v47   ;;  %v707_v43 = vpop.f32.mrf.mxu2  ;;  %v1111_v10 = vpop.f32.mrf.mxu0 }
 0x118   : > { %v988_v48 = vpop.f32.mrf.mxu3  ;;  %v2394_v22 = vadd.f32 %v707_v43, %v2249_v1 }
 0x119   : > { %v1110_v14 = vadd.f32 %v1109_v5, %v988_v48 }
 0x11a   : > { %v1251_v11 = vpop.f32.mrf.mxu1 }
 0x11b   : > { %v2402_v34 = vadd.f32 %v1249_v3, %v1110_v14 }
 0x11f   : > { %v709_v15 = vpop.f32.mrf.mxu2  ;;  %v1114_v27 = vpop.f32.mrf.mxu0 }
 0x120   : > { %v2397_v24 = vadd.f32 %v709_v15, %v2257_v8  ;;  %v990_v25 = vpop.f32.mrf.mxu3  ;;  %v747_v8 = vadd.f32 %v746_v36, %v2361_v41 }
 0x121   : > { %v1112_v26 = vadd.f32 %v1111_v10, %v990_v25  ;;  %v1285_v10 = vadd.f32 %v2328_v7, %v2326_v6 }
 0x122   : > { %v1979_v13 = vpack.c.bf16 %v2397_v24, %v2394_v22  ;;  %v1254_v18 = vpop.f32.mrf.mxu1  ;;  %v748_v39 = vadd.f32 %v747_v8, %v2376_v59 }
 0x123   : > { %v2404_v35 = vadd.f32 %v1251_v11, %v1112_v26  ;;  %v1286_v12 = vadd.f32 %v1285_v10, %v2348_v29 }
 0x124   : > { %2039 = vst [vmem:[%s2322_s13 + $0x20] sm:$0xff] %v1979_v13   ;;  %v749_v45 = vadd.f32 %v748_v39, %v2378_v60 }
 0x125   : > { %v2019_v1 = vpack.c.bf16 %v2404_v35, %v2402_v34  ;;  %v1287_v15 = vadd.f32 %v1286_v12, %v2350_v30 }
 0x126   : > { %v750_v50 = vadd.f32 %v749_v45, %v2394_v22 }
 0x127   : > { %2046 = vst [vmem:[%s2334_s16 + $0x20] sm:$0xff] %v2019_v1   ;;  %v712_v37 = vpop.f32.mrf.mxu2  ;;  %v1116_v44 = vpop.f32.mrf.mxu0  ;;  %v1288_v25 = vadd.f32 %v1287_v15, %v2365_v52 }
 0x128   : > { %v993_v42 = vpop.f32.mrf.mxu3  ;;  %v2416_v32 = vadd.f32 %v712_v37, %v2267_v16  ;;  %v751_v28 = vadd.f32 %v750_v50, %v2397_v24 }
 0x129   : > { %v1115_v33 = vadd.f32 %v1114_v27, %v993_v42  ;;  %v1289_v13 = vadd.f32 %v1288_v25, %v2367_v53 }
 0x12a   : > { %v1256_v49 = vpop.f32.mrf.mxu1  ;;  %v752_v55 = vadd.f32 %v751_v28, %v2416_v32 }
 0x12b   : > { %v2426_v16 = vadd.f32 %v1254_v18, %v1115_v33  ;;  %v1290_v8 = vadd.f32 %v1289_v13, %v2382_v62 }
 0x12d   : > { %v1291_v42 = vadd.f32 %v1290_v8, %v2384_v9 }
 0x12f   : > { %v714_v54 = vpop.f32.mrf.mxu2  ;;  %v1119_v5 = vpop.f32.mrf.mxu0  ;;  %v1292_v45 = vadd.f32 %v1291_v42, %v2402_v34 }
 0x130   : > { %v2421_v56 = vadd.f32 %v714_v54, %v2275_v23  ;;  %v995_v57 = vpop.f32.mrf.mxu3 }
 0x131   : > { %v1117_v58 = vadd.f32 %v1116_v44, %v995_v57  ;;  %v1293_v54 = vadd.f32 %v1292_v45, %v2404_v35 }
 0x132   : > { %v753_v0 = vadd.f32 %v752_v55, %v2421_v56  ;;  %v1984_v4 = vpack.c.bf16 %v2421_v56, %v2416_v32  ;;  %v1259_v3 = vpop.f32.mrf.mxu1 }
 0x133   : > { %v2428_v2 = vadd.f32 %v1256_v49, %v1117_v58  ;;  %v1294_v57 = vadd.f32 %v1293_v54, %v2426_v16 }
 0x134   : > { %2040 = vst [vmem:[%s2322_s13 + $0x28] sm:$0xff] %v1984_v4  }
 0x135   : > { %v2024_v47 = vpack.c.bf16 %v2428_v2, %v2426_v16 }
 0x137   : > { %2047 = vst [vmem:[%s2334_s16 + $0x28] sm:$0xff] %v2024_v47   ;;  %v717_v23 = vpop.f32.mrf.mxu2  ;;  %v1121_v14 = vpop.f32.mrf.mxu0 }
 0x138   : > { %v2435_v43 = vadd.f32 %v717_v23, %v2285_v31  ;;  %v998_v48 = vpop.f32.mrf.mxu3 }
 0x139   : > { %v1120_v26 = vadd.f32 %v1119_v5, %v998_v48 }
 0x13a   : > { %v754_v11 = vadd.f32 %v753_v0, %v2435_v43  ;;  %v1261_v19 = vpop.f32.mrf.mxu1  ;;  %v1295_v0 = vadd.f32 %v1294_v57, %v2428_v2 }
 0x13b   : > { %v2447_v37 = vadd.f32 %v1259_v3, %v1120_v26 }
 0x13d   : > { %v1296_v4 = vadd.f32 %v1295_v0, %v2447_v37 }
 0x13f   : > { %v719_v27 = vpop.f32.mrf.mxu2 }
 0x140   : > { %v740_v31 = vadd.f32 %v719_v27, %v2293_v38  ;;  %v1000_v17 = vpop.f32.mrf.mxu3  ;;  %v1124_v38 = vpop.f32.mrf.mxu0 }
 0x141   : > { %v1122_v18 = vadd.f32 %v1121_v14, %v1000_v17 }
 0x142   : > { %v755_v36 = vadd.f32 %v754_v11, %v740_v31  ;;  %v1989_v1 = vpack.c.bf16 %v740_v31, %v2435_v43  ;;  %v1264_v50 = vpop.f32.mrf.mxu1 }
 0x143   : > { %v2449_v39 = vadd.f32 %v1261_v19, %v1122_v18 }
 0x144   : > { %2041 = vst [vmem:[%s2322_s13 + $0x30] sm:$0xff] %v1989_v1  }
 0x145   : > { %v2029_v44 = vpack.c.bf16 %v2449_v39, %v2447_v37  ;;  %v1297_v48 = vadd.f32 %v1296_v4, %v2449_v39 }
 0x147   : > { %2048 = vst [vmem:[%s2334_s16 + $0x30] sm:$0xff] %v2029_v44   ;;  %v722_v49 = vpop.f32.mrf.mxu2 }
 0x148   : > { %v741_v28 = vadd.f32 %v722_v49, %v2303_v46  ;;  %v1003_v33 = vpop.f32.mrf.mxu3  ;;  %v1126_v47 = vpop.f32.mrf.mxu0 }
 0x149   : > { %v1125_v58 = vadd.f32 %v1124_v38, %v1003_v33 }
 0x14a   : > { %v756_v55 = vadd.f32 %v755_v36, %v741_v28  ;;  %v1266_v11 = vpop.f32.mrf.mxu1 }
 0x14b   : > { %v2462_v5 = vadd.f32 %v1264_v50, %v1125_v58 }
 0x14d   : > { %v1298_v15 = vadd.f32 %v1297_v48, %v2462_v5 }
 0x14f   : > { %v724_v3 = vpop.f32.mrf.mxu2 }
 0x150   : > { %v742_v23 = vadd.f32 %v724_v3, %v2309_v51  ;;  %v1005_v46 = vpop.f32.mrf.mxu3 }
 0x151   : > { %v1127_v10 = vadd.f32 %v1126_v47, %v1005_v46 }
 0x152   : > { %v757_v12 = vadd.f32 %v756_v55, %v742_v23  ;;  %v1994_v14 = vpack.c.bf16 %v742_v23, %v741_v28 }
 0x153   : > { %v2467_v19 = vadd.f32 %v1266_v11, %v1127_v10 }
 0x154   : > { %v758_v25 = vrot.slane %v757_v12, 4  ;;  %2042 = vst [vmem:[%s2322_s13 + $0x38] sm:$0xff] %v1994_v14  }
 0x155   : > { %v1299_v26 = vadd.f32 %v1298_v15, %v2467_v19  ;;  %v2034_v27 = vpack.c.bf16 %v2467_v19, %v2462_v5 }
 0x156   : > { %v759_v17 = vadd.f32 %v758_v25, %v757_v12 }
 0x157   : > { %v1300_v51 = vrot.slane %v1299_v26, 4  ;;  %2049 = vst [vmem:[%s2334_s16 + $0x38] sm:$0xff] %v2034_v27  }
 0x158   : > { %v760_v13 = vrot.slane %v759_v17, 2 }
 0x159   : > { %v1301_v18 = vadd.f32 %v1300_v51, %v1299_v26 }
 0x15a   : > { %v761_v36 = vadd.f32 %v760_v13, %v759_v17 }
 0x15b   : > { %v1302_v1 = vrot.slane %v1301_v18, 2 }
 0x15c   : > { %v762_v8 = vrot.slane %v761_v36, 1 }
 0x15d   : > { %v1303_v44 = vadd.f32 %v1302_v1, %v1301_v18 }
 0x15e   : > { %v763_v42 = vadd.f32 %v762_v8, %v761_v36 }
 0x15f   : > { %v1304_v50 = vrot.slane %v1303_v44, 1 }
 0x160   : > { %v2474_v38 = vmul.f32 0.0078125, %v763_v42 }
 0x161   : > { %v1305_v4 = vadd.f32 %v1304_v50, %v1303_v44 }
 0x162   : > { %v765_v45 = vsub.f32 %v2315_v61, %v2474_v38  ;;  %v766_v49 = vsub.f32 %v2317_v63, %v2474_v38  ;;  %v775_v33 = vsub.f32 %v2416_v32, %v2474_v38  ;;  %v776_v54 = vsub.f32 %v2421_v56, %v2474_v38 }
 0x163   : > { %v777_v55 = vsub.f32 %v2435_v43, %v2474_v38  ;;  %v2487_v57 = vsub.f32 %v740_v31, %v2474_v38  ;;  %v2490_v58 = vsub.f32 %v741_v28, %v2474_v38  ;;  %v2493_v61 = vsub.f32 %v742_v23, %v2474_v38 }
 0x164   : > { %v767_v63 = vsub.f32 %v2342_v20, %v2474_v38  ;;  %v781_v0 = vmul.f32 %v765_v45, %v765_v45  ;;  %v782_v32 = vmul.f32 %v766_v49, %v766_v49  ;;  %v768_v56 = vsub.f32 %v2344_v21, %v2474_v38 }
 0x165   : > { %v769_v43 = vsub.f32 %v2359_v40, %v2474_v38  ;;  %v2501_v47 = vmul.f32 0.0078125, %v1305_v4  ;;  %v770_v28 = vsub.f32 %v2361_v41, %v2474_v38  ;;  %v771_v21 = vsub.f32 %v2376_v59, %v2474_v38 }
 0x166   : > { %v783_v31 = vmul.f32 %v767_v63, %v767_v63  ;;  %v797_v3 = vadd.f32 %v782_v32, %v781_v0  ;;  %v784_v23 = vmul.f32 %v768_v56, %v768_v56  ;;  %v772_v11 = vsub.f32 %v2378_v60, %v2474_v38 }
 0x167   : > { %v1307_v20 = vsub.f32 %v2326_v6, %v2501_v47  ;;  %v1308_v48 = vsub.f32 %v2328_v7, %v2501_v47  ;;  %v785_v10 = vmul.f32 %v769_v43, %v769_v43  ;;  %v786_v12 = vmul.f32 %v770_v28, %v770_v28 }
 0x168   : > { %v798_v46 = vadd.f32 %v797_v3, %v783_v31  ;;  %v1309_v41 = vsub.f32 %v2348_v29, %v2501_v47  ;;  %v773_v6 = vsub.f32 %v2394_v22, %v2474_v38  ;;  %v787_v7 = vmul.f32 %v771_v21, %v771_v21 }
 0x169   : > { %v1323_v15 = vmul.f32 %v1307_v20, %v1307_v20  ;;  %v1324_v25 = vmul.f32 %v1308_v48, %v1308_v48  ;;  %v1310_v59 = vsub.f32 %v2350_v30, %v2501_v47  ;;  %v774_v27 = vsub.f32 %v2397_v24, %v2474_v38 }
 0x16a   : > { %v799_v40 = vadd.f32 %v798_v46, %v784_v23  ;;  %v788_v60 = vmul.f32 %v772_v11, %v772_v11  ;;  %v1311_v51 = vsub.f32 %v2365_v52, %v2501_v47  ;;  %v1325_v29 = vmul.f32 %v1309_v41, %v1309_v41 }
 0x16b   : > { %v1339_v13 = vadd.f32 %v1324_v25, %v1323_v15  ;;  %v1392_v18 = vadd.f32 %v2501_v47, %v2474_v38  ;;  %v789_v36 = vmul.f32 %v773_v6, %v773_v6  ;;  %v1312_v30 = vsub.f32 %v2367_v53, %v2501_v47 }
 0x16c   : > { %v800_v14 = vadd.f32 %v799_v40, %v785_v10  ;;  %v1326_v24 = vmul.f32 %v1310_v59, %v1310_v59  ;;  %v790_v42 = vmul.f32 %v774_v27, %v774_v27  ;;  %v1313_v52 = vsub.f32 %v2382_v62, %v2501_v47 }
 0x16d   : > { %v1340_v1 = vadd.f32 %v1339_v13, %v1325_v29  ;;  %v1393_v8 = vmul.f32 0.5, %v1392_v18  ;;  %v1327_v45 = vmul.f32 %v1311_v51, %v1311_v51  ;;  %v791_v50 = vmul.f32 %v775_v33, %v775_v33 }
 0x16e   : > { %v801_v26 = vadd.f32 %v800_v14, %v786_v12  ;;  %v1314_v0 = vsub.f32 %v2384_v9, %v2501_v47  ;;  %v1328_v32 = vmul.f32 %v1312_v30, %v1312_v30  ;;  %v792_v56 = vmul.f32 %v776_v54, %v776_v54 }
 0x16f   : > { %v1341_v49 = vadd.f32 %v1340_v1, %v1326_v24  ;;  %1399 = vst [vmem:[%s299_s19] sm:$0x1] %v1393_v8  ;;  %v1315_v43 = vsub.f32 %v2402_v34, %v2501_v47  ;;  %v1329_v31 = vmul.f32 %v1313_v52, %v1313_v52  ;;  %v793_v28 = vmul.f32 %v777_v55, %v777_v55 }
 0x170   : > { %v802_v17 = vadd.f32 %v801_v26, %v787_v7  ;;  %v1316_v62 = vsub.f32 %v2404_v35, %v2501_v47  ;;  %v1330_v46 = vmul.f32 %v1314_v0, %v1314_v0  ;;  %v794_v20 = vmul.f32 %v2487_v57, %v2487_v57 }
 0x171   : > { %v1342_v4 = vadd.f32 %v1341_v49, %v1327_v45  ;;  %v1317_v54 = vsub.f32 %v2426_v16, %v2501_v47  ;;  %v1331_v48 = vmul.f32 %v1315_v43, %v1315_v43  ;;  %v795_v34 = vmul.f32 %v2490_v58, %v2490_v58 }
 0x172   : > { %v803_v22 = vadd.f32 %v802_v17, %v788_v60  ;;  %v1318_v55 = vsub.f32 %v2428_v2, %v2501_v47  ;;  %v1332_v40 = vmul.f32 %v1316_v62, %v1316_v62  ;;  %v796_v11 = vmul.f32 %v2493_v61, %v2493_v61 }
 0x173   : > { %v1343_v3 = vadd.f32 %v1342_v4, %v1328_v32  ;;  %v1319_v57 = vsub.f32 %v2447_v37, %v2501_v47  ;;  %v1333_v14 = vmul.f32 %v1317_v54, %v1317_v54  ;;  %v1320_v15 = vsub.f32 %v2449_v39, %v2501_v47 }
 0x174   : > { %v804_v44 = vadd.f32 %v803_v22, %v789_v36  ;;  %v1334_v58 = vmul.f32 %v1318_v55, %v1318_v55  ;;  %v1321_v2 = vsub.f32 %v2462_v5, %v2501_v47  ;;  %v1322_v61 = vsub.f32 %v2467_v19, %v2501_v47 }
 0x175   : > { %v1344_v33 = vadd.f32 %v1343_v3, %v1329_v31  ;;  %v1335_v7 = vmul.f32 %v1319_v57, %v1319_v57  ;;  %v1336_v59 = vmul.f32 %v1320_v15, %v1320_v15  ;;  %v1394_v5 = vsub.f32 %v2474_v38, %v2501_v47 }
 0x176   : > { %v805_v63 = vadd.f32 %v804_v44, %v790_v42  ;;  %v1337_v60 = vmul.f32 %v1321_v2, %v1321_v2  ;;  %v1338_v51 = vmul.f32 %v1322_v61, %v1322_v61 }
 0x177   : > { %v1345_v21 = vadd.f32 %v1344_v33, %v1330_v46  ;;  %v1396_v8 = vmul.f32 64.0, %v1394_v5 }
 0x178   : > { %v806_v53 = vadd.f32 %v805_v63, %v791_v50 }
 0x179   : > { %v1346_v35 = vadd.f32 %v1345_v21, %v1331_v48  ;;  %v1397_v45 = vmul.f32 %v1396_v8, %v1394_v5 }
 0x17a   : > { %v807_v23 = vadd.f32 %v806_v53, %v792_v56 }
 0x17b   : > { %v1347_v16 = vadd.f32 %v1346_v35, %v1332_v40 }
 0x17c   : > { %v808_v9 = vadd.f32 %v807_v23, %v793_v28 }
 0x17d   : > { %v1348_v25 = vadd.f32 %v1347_v16, %v1333_v14 }
 0x17e   : > { %v809_v10 = vadd.f32 %v808_v9, %v794_v20 }
 0x17f   : > { %v1349_v26 = vadd.f32 %v1348_v25, %v1334_v58 }
 0x180   : > { %v810_v12 = vadd.f32 %v809_v10, %v795_v34 }
 0x181   : > { %v1350_v27 = vadd.f32 %v1349_v26, %v1335_v7 }
 0x182   : > { %v811_v41 = vadd.f32 %v810_v12, %v796_v11 }
 0x183   : > { %v1351_v17 = vadd.f32 %v1350_v27, %v1336_v59 }
 0x184   : > { %v812_v6 = vrot.slane %v811_v41, 4 }
 0x185   : > { %v1352_v29 = vadd.f32 %v1351_v17, %v1337_v60 }
 0x186   : > { %v813_v37 = vadd.f32 %v812_v6, %v811_v41 }
 0x187   : > { %v1353_v13 = vadd.f32 %v1352_v29, %v1338_v51 }
 0x188   : > { %v814_v39 = vrot.slane %v813_v37, 2 }
 0x189   : > { %v1354_v18 = vrot.slane %v1353_v13, 4 }
 0x18a   : > { %v815_v36 = vadd.f32 %v814_v39, %v813_v37 }
 0x18b   : > { %v1355_v22 = vadd.f32 %v1354_v18, %v1353_v13 }
 0x18c   : > { %v816_v24 = vrot.slane %v815_v36, 1 }
 0x18d   : > { %v1356_v30 = vrot.slane %v1355_v22, 2 }
 0x18e   : > { %v817_v42 = vadd.f32 %v816_v24, %v815_v36 }
 0x18f   : > { %v1357_v1 = vadd.f32 %v1356_v30, %v1355_v22 }
 0x191   : > { %v1358_v19 = vrot.slane %v1357_v1, 1 }
 0x193   : > { %v1359_v44 = vadd.f32 %v1358_v19, %v1357_v1 }
 0x195   : > { %v1395_v52 = vadd.f32 %v1359_v44, %v817_v42 }
 0x197   : > { %v1398_v49 = vadd.f32 %v1397_v45, %v1395_v52 }
 0x199   : > { %1400 = vst [vmem:[%s302_s24] sm:$0x1] %v1398_v49 }
 0x19a PF: > { %s17_s21 = sadd.s32 1, %s2067_s21  }
 0x19b   : > { %p14_p5 = scmp.ge.s32.totalorder %s17_s21, 4  }
 0x19d   :  { %16 = sbr.rel (!%p14_p5) target bundleno = 1 (0x1), region = 107 }

</bundles_post_ra>
